<compile_context>
chip_gen: v6e
topology: v6e:2x2x1
jax: 0.10.0
libtpu: 0.0.40
codegen_flags: <defaults>
</compile_context>

<pallas_src>
import functools

import numpy as np
import jax
import jax.numpy as jnp
from jax.experimental import pallas as pl
from jax.experimental.pallas import tpu as pltpu


# 3x3 tap offsets in raster (dy, dx) order; centre tap is index 4.
_TAPS = tuple((dy, dx) for dy in (-1, 0, 1) for dx in (-1, 0, 1))
_NB_TAPS = tuple(t for t in _TAPS if t != (0, 0))


# =============================================================================
# Fused kernel: conv chain + crop + CRF, one batch row per grid step.
# All activations are (C, H*W) with H*W on the 128-lane axis.
# =============================================================================
def _seghead_kernel(x_ref, g_ref,
                    w_sq1_ref, b_sq1_ref, w_dc_ref, b_dc_ref,
                    p_even_ref, p_odd_ref, w_e1_ref, b_e1_ref,
                    w_sq2_ref, b_sq2_ref, w_e2_ref, b_e2_ref,
                    w_cls_ref, b_cls_ref, c_crop_ref, compat_t_ref,
                    mask_dc_ref, mask_conv_ref, mask_crf_ref,
                    out_ref, *, h, wi, wd, crf_iters, inv2s2):
    f32 = jnp.float32
    bf16 = jnp.bfloat16
    w2 = 2 * wi
    sq = w_sq1_ref.shape[0]

    def mdot(a, b):
        # bf16 MXU operands, f32 accumulation.
        return jnp.dot(a.astype(bf16), b.astype(bf16), preferred_element_type=f32)

    def shift(t, dy, dx, w_, mask_row):
        """t: (c, h*w_) flattened plane -> value at spatial neighbour (y+dy, x+dx).
        mask_row: (1, h*w_) 0/1 float validity mask (precomputed on host); pass
        None for an unmasked cyclic roll (centre tap, or when wrap-around is
        killed elsewhere, e.g. by the zeroed CRF bilateral weights)."""
        k = dy * w_ + dx
        r = t if k == 0 else pltpu.roll(t, (-k) % t.shape[-1], t.ndim - 1)
        return r if mask_row is None else r * mask_row

    def conv3x3(act, w_ref, b_ref, mask9):
        """Fused (expand1x1 || expand3x3) conv + ReLU as ONE im2col matmul.
        act: (c, h*w2); w_ref: (cout, 9*c), taps in raster (dy, dx) order."""
        cols = []
        for i, (dy, dx) in enumerate(_TAPS):
            m = None if (dy, dx) == (0, 0) else mask9[i:i + 1]
            cols.append(shift(act, dy, dx, w2, m))
        patch = jnp.concatenate(cols, axis=0)                 # (9c, h*w2)
        return jnp.maximum(mdot(w_ref[...], patch) + b_ref[...], 0.0)

    # ---- DeFire squeeze (1x1 conv + ReLU): (sq, h*wi) ------------------------
    a = jnp.maximum(mdot(w_sq1_ref[...], x_ref[...]) + b_sq1_ref[...], 0.0)

    # ---- DeFire deconv: ConvTranspose2d(k=(1,4), s=(1,2), p=(0,1)) -----------
    # Even/odd output-width phases, fused into one matmul over [a; a(x-1); a(x+1)]:
    #   even[m] = tap1 @ a[m] + tap3 @ a[m-1];  odd[m] = tap2 @ a[m] + tap0 @ a[m+1]
    mdc = mask_dc_ref[...]
    a_prev = shift(a, 0, -1, wi, mdc[0:1])
    a_next = shift(a, 0, +1, wi, mdc[1:2])
    d_both = jnp.maximum(
        mdot(w_dc_ref[...], jnp.concatenate([a, a_prev, a_next], axis=0))
        + b_dc_ref[...], 0.0)                                 # (2*sq, h*wi)
    # Interleave the phases to full width 2*wi with 0/1 scatter matrices on the
    # MXU (avoids in-kernel relayout reshapes).
    d_full = (mdot(d_both[:sq], p_even_ref[...])
              + mdot(d_both[sq:], p_odd_ref[...]))            # (sq, h*w2)

    # ---- DeFire expand -> Fire squeeze -> Fire expand -> classifier ----------
    m9 = mask_conv_ref[...]
    y1 = conv3x3(d_full, w_e1_ref, b_e1_ref, m9)              # (mid, h*w2)
    s_act = jnp.maximum(mdot(w_sq2_ref[...], y1) + b_sq2_ref[...], 0.0)   # (sq, h*w2)
    y2 = conv3x3(s_act, w_e2_ref, b_e2_ref, m9)               # (mid, h*w2)
    logits = mdot(w_cls_ref[...], y2) + b_cls_ref[...]        # (nc, h*w2) no relu/norm
    # Width crop to data_input width (== result[..., d//2:-(d//2)]) via a 0/1
    # column-selection matmul (f32, keeps the unary potentials exact).
    unary = jnp.dot(logits, c_crop_ref[...], preferred_element_type=f32)  # (nc, h*wd)

    # ---- CRF: mean-field with Gaussian bilateral 3x3 message passing ---------
    g = g_ref[...]                                            # (cg, h*wd)
    mcrf = mask_crf_ref[...]
    ws, shifts = [], []
    for i, (dy, dx) in enumerate(_NB_TAPS):
        k = dy * wd + dx
        sh = (-k) % g.shape[-1]
        shifts.append(sh)
        diff = g - pltpu.roll(g, sh, 1)
        d2 = jnp.sum(diff * diff, axis=0, keepdims=True)      # (1, h*wd)
        # OOB validity is folded into the bilateral weight ONCE, so the hot
        # mean-field loop below uses plain unmasked rolls.
        ws.append(mcrf[i:i + 1] * jnp.exp(-d2 * inv2s2))

    compat_t = compat_t_ref[...]                              # (nc, nc) = compat.T
    q = unary
    for _ in range(crf_iters):
        mmax = jnp.max(q, axis=0, keepdims=True)
        e = jnp.exp(q - mmax)
        denom = jnp.sum(e, axis=0, keepdims=True)
        prob = e * pl.reciprocal(denom, approx=True)          # EUP; tiny sum!=1 drift
        msg = ws[0] * pltpu.roll(prob, shifts[0], 1)
        for i in range(1, len(ws)):
            msg = msg + ws[i] * pltpu.roll(prob, shifts[i], 1)
        # Compatibility transform on the (otherwise idle) MXU.
        pw = jnp.dot(compat_t, msg, preferred_element_type=f32)
        q = unary - pw
    out_ref[...] = q                                          # (nc, h*wd) lane-dense


# =============================================================================
# Host-side geometry constants (0/1 matrices and validity masks).
# =============================================================================
def _build_geometry(h, wi, wd):
    w2 = 2 * wi
    sp1, sp2, spd = h * wi, h * w2, h * wd

    p_even = np.zeros((sp1, sp2), np.float32)
    p_odd = np.zeros((sp1, sp2), np.float32)
    for y in range(h):
        for m in range(wi):
            p_even[y * wi + m, y * w2 + 2 * m] = 1.0
            p_odd[y * wi + m, y * w2 + 2 * m + 1] = 1.0

    diff = w2 - wd
    assert diff >= 0 and diff % 2 == 0, "width crop assumes even, non-negative diff"
    start = diff // 2
    c_crop = np.zeros((sp2, spd), np.float32)
    for y in range(h):
        for x in range(wd):
            c_crop[y * w2 + start + x, y * wd + x] = 1.0

    def flat_mask(hh, ww, dy, dx):
        ys = np.arange(hh)[:, None]
        xs = np.arange(ww)[None, :]
        valid = (ys + dy >= 0) & (ys + dy < hh) & (xs + dx >= 0) & (xs + dx < ww)
        return valid.astype(np.float32).reshape(-1)

    mask_dc = np.stack([flat_mask(h, wi, 0, -1), flat_mask(h, wi, 0, 1)], 0)
    mask_conv = np.stack([flat_mask(h, w2, dy, dx) for dy, dx in _TAPS], 0)
    mask_crf = np.stack([flat_mask(h, wd, dy, dx) for dy, dx in _NB_TAPS], 0)
    return p_even, p_odd, c_crop, mask_dc, mask_conv, mask_crf


# =============================================================================
# SegmentHead forward
# =============================================================================
def segment_head_forward(p, data_input, features, *, crf_iters, crf_start_dim,
                         crf_dims, sigma):
    """data_input, features: NCHW (PyTorch convention). Returns NCHW output."""
    n, cin, h, wi = features.shape
    wd = data_input.shape[-1]
    nc = p["w_cls"].shape[0]
    sp1, spd = h * wi, h * wd

    p_even, p_odd, c_crop, mask_dc, mask_conv, mask_crf = _build_geometry(h, wi, wd)

    bf16 = jnp.bfloat16
    consts = [
        p["w_sq1"].astype(bf16), p["b_sq1"],
        p["w_dc"].astype(bf16), p["b_dc"],
        jnp.asarray(p_even, bf16), jnp.asarray(p_odd, bf16),
        p["w_e1"].astype(bf16), p["b_e1"],
        p["w_sq2"].astype(bf16), p["b_sq2"],
        p["w_e2"].astype(bf16), p["b_e2"],
        p["w_cls"].astype(bf16), p["b_cls"],
        jnp.asarray(c_crop), jnp.transpose(p["compat"]),
        jnp.asarray(mask_dc), jnp.asarray(mask_conv), jnp.asarray(mask_crf),
    ]

    # Free row-major reshapes: channels stay leading, flattened H*W rides the lanes.
    x_flat = features.reshape(n, cin, sp1)
    guide = data_input[:, crf_start_dim:crf_start_dim + crf_dims].reshape(
        n, crf_dims, spd)

    kernel = functools.partial(_seghead_kernel, h=h, wi=wi, wd=wd,
                               crf_iters=int(crf_iters),
                               inv2s2=0.5 / float(sigma) ** 2)

    def const_spec(arr):
        return pl.BlockSpec(arr.shape, lambda i: (0,) * arr.ndim)

    out_flat = pl.pallas_call(
        kernel,
        out_shape=jax.ShapeDtypeStruct((n, nc, spd), jnp.float32),
        grid=(n,),
        in_specs=[pl.BlockSpec((None, cin, sp1), lambda i: (i, 0, 0)),
                  pl.BlockSpec((None, crf_dims, spd), lambda i: (i, 0, 0))]
                 + [const_spec(c) for c in consts],
        out_specs=pl.BlockSpec((None, nc, spd), lambda i: (i, 0, 0)),
        compiler_params=pltpu.CompilerParams(
            dimension_semantics=("parallel",),
            vmem_limit_bytes=32 * 1024 * 1024),
    )(x_flat, guide, *consts)
    # Splitting the flattened spatial axis back into (H, Wd) is metadata-only.
    return out_flat.reshape(n, nc, h, wd)


# =============================================================================
# Deterministic synthetic parameter init (channels-first, BN affine folded in).
# =============================================================================
def init_params(key, in_channels, mid_channels, num_classes):
    sq = mid_channels // 16
    ex = mid_channels // 2
    mid = 2 * ex
    f32 = jnp.float32
    ks = jax.random.split(key, 15)

    def nrm(k, shape, scale=0.2):
        return scale * jax.random.normal(k, shape, f32)

    p = {}
    p["w_sq1"] = nrm(ks[0], (sq, in_channels))
    p["b_sq1"] = nrm(ks[1], (sq, 1))

    # ConvTranspose2d(sq, sq, (1,4), stride=(1,2), pad=(0,1)); tap_k[co, ci] == W_pt[ci, co, 0, k]
    #   even[m] = tap1 @ a[m] + tap3 @ a[m-1];  odd[m] = tap2 @ a[m] + tap0 @ a[m+1]
    taps4 = nrm(ks[2], (4, sq, sq))
    b_d = nrm(ks[3], (sq, 1))
    w_dc = jnp.zeros((2 * sq, 3 * sq), f32)
    w_dc = w_dc.at[:sq, 0:sq].set(taps4[1]).at[:sq, sq:2 * sq].set(taps4[3])
    w_dc = w_dc.at[sq:, 0:sq].set(taps4[2]).at[sq:, 2 * sq:3 * sq].set(taps4[0])
    p["w_dc"] = w_dc
    p["b_dc"] = jnp.concatenate([b_d, b_d], axis=0)

    def fused_expand(k1, k2, k3, cin_):
        # concat([expand1x1, expand3x3]) as one (2*ex, 9*cin_) im2col weight;
        # taps in raster (dy, dx) order, centre tap index 4 carries the 1x1 part.
        e1 = nrm(k1, (ex, cin_))
        e3 = nrm(k2, (ex, 9, cin_))
        b = nrm(k3, (2 * ex, 1))
        w = jnp.zeros((2 * ex, 9, cin_), f32)
        w = w.at[:ex, 4, :].set(e1)
        w = w.at[ex:, :, :].set(e3)
        return w.reshape(2 * ex, 9 * cin_), b

    p["w_e1"], p["b_e1"] = fused_expand(ks[4], ks[5], ks[6], sq)
    p["w_sq2"] = nrm(ks[7], (sq, mid))
    p["b_sq2"] = nrm(ks[8], (sq, 1))
    p["w_e2"], p["b_e2"] = fused_expand(ks[9], ks[10], ks[11], sq)
    p["w_cls"] = nrm(ks[12], (num_classes, mid))
    p["b_cls"] = nrm(ks[13], (num_classes, 1))
    # Potts-like compatibility matrix + small deterministic perturbation.
    p["compat"] = (0.5 * (1.0 - jnp.eye(num_classes, dtype=f32))
                   + 0.05 * jax.random.normal(
                       ks[14], (num_classes, num_classes), f32))
    return p


if __name__ == "__main__":
    IN_CH, MID_CH, NUM_CLASSES = 8, 32, 4
    CRF_ITERS, CRF_START, CRF_DIMS, SIGMA = 3, 0, 3, 0.75

    key = jax.random.PRNGKey(0)
    kparam, kdata, kfeat = jax.random.split(key, 3)
    params = init_params(kparam, IN_CH, MID_CH, NUM_CLASSES)

    # data_input: (N, 5, H, W) lidar-style input (x,y,z,intensity,range), W=12
    # features:   (N, in_channels, H, W/2); the DeFire deconv doubles W to 16,
    # which is then cropped back to 12 to match data_input.
    data_input = jax.random.normal(kdata, (2, 5, 8, 12), jnp.float32)
    features = jax.random.normal(kfeat, (2, IN_CH, 8, 8), jnp.float32)

    fwd = jax.jit(functools.partial(
        segment_head_forward, crf_iters=CRF_ITERS, crf_start_dim=CRF_START,
        crf_dims=CRF_DIMS, sigma=SIGMA))
    out = jax.block_until_ready(fwd(params, data_input, features))

    assert out.shape == (2, NUM_CLASSES, 8, 12), out.shape
    assert bool(jnp.all(jnp.isfinite(out)))
    print("KERNEL_OK")
</pallas_src>

<mosaic_0001>
module attributes {stable_mosaic.version = 11 : i64} {
  func.func @_seghead_kernel(%arg0: i32, %arg1: memref<1x8x64xf32, #tpu.memory_space<vmem>>, %arg2: memref<1x3x96xf32, #tpu.memory_space<vmem>>, %arg3: memref<2x8xbf16, #tpu.memory_space<vmem>>, %arg4: memref<2x1xf32, #tpu.memory_space<vmem>>, %arg5: memref<4x6xbf16, #tpu.memory_space<vmem>>, %arg6: memref<4x1xf32, #tpu.memory_space<vmem>>, %arg7: memref<64x128xbf16, #tpu.memory_space<vmem>>, %arg8: memref<64x128xbf16, #tpu.memory_space<vmem>>, %arg9: memref<32x18xbf16, #tpu.memory_space<vmem>>, %arg10: memref<32x1xf32, #tpu.memory_space<vmem>>, %arg11: memref<2x32xbf16, #tpu.memory_space<vmem>>, %arg12: memref<2x1xf32, #tpu.memory_space<vmem>>, %arg13: memref<32x18xbf16, #tpu.memory_space<vmem>>, %arg14: memref<32x1xf32, #tpu.memory_space<vmem>>, %arg15: memref<4x32xbf16, #tpu.memory_space<vmem>>, %arg16: memref<4x1xf32, #tpu.memory_space<vmem>>, %arg17: memref<128x96xf32, #tpu.memory_space<vmem>>, %arg18: memref<4x4xf32, #tpu.memory_space<vmem>>, %arg19: memref<2x64xf32, #tpu.memory_space<vmem>>, %arg20: memref<9x128xf32, #tpu.memory_space<vmem>>, %arg21: memref<8x96xf32, #tpu.memory_space<vmem>>, %arg22: memref<1x4x96xf32, #tpu.memory_space<vmem>>) attributes {dimension_semantics = [#tpu.dimension_semantics<parallel>], iteration_bounds = array<i64: 2>, scalar_prefetch = 0 : i64, scratch_operands = 0 : i64, tpu.core_type = #tpu.core_type<tc>, window_params = [{transform_indices = @transform_0, window_bounds = array<i64: 1, 8, 64>}, {transform_indices = @transform_1, window_bounds = array<i64: 1, 3, 96>}, {pipeline_mode = #tpu.pipeline_mode<synchronous>, transform_indices = @transform_2, window_bounds = array<i64: 2, 8>}, {pipeline_mode = #tpu.pipeline_mode<synchronous>, transform_indices = @transform_3, window_bounds = array<i64: 2, 1>}, {pipeline_mode = #tpu.pipeline_mode<synchronous>, transform_indices = @transform_4, window_bounds = array<i64: 4, 6>}, {pipeline_mode = #tpu.pipeline_mode<synchronous>, transform_indices = @transform_5, window_bounds = array<i64: 4, 1>}, {pipeline_mode = #tpu.pipeline_mode<synchronous>, transform_indices = @transform_6, window_bounds = array<i64: 64, 128>}, {pipeline_mode = #tpu.pipeline_mode<synchronous>, transform_indices = @transform_7, window_bounds = array<i64: 64, 128>}, {pipeline_mode = #tpu.pipeline_mode<synchronous>, transform_indices = @transform_8, window_bounds = array<i64: 32, 18>}, {pipeline_mode = #tpu.pipeline_mode<synchronous>, transform_indices = @transform_9, window_bounds = array<i64: 32, 1>}, {pipeline_mode = #tpu.pipeline_mode<synchronous>, transform_indices = @transform_10, window_bounds = array<i64: 2, 32>}, {pipeline_mode = #tpu.pipeline_mode<synchronous>, transform_indices = @transform_11, window_bounds = array<i64: 2, 1>}, {pipeline_mode = #tpu.pipeline_mode<synchronous>, transform_indices = @transform_12, window_bounds = array<i64: 32, 18>}, {pipeline_mode = #tpu.pipeline_mode<synchronous>, transform_indices = @transform_13, window_bounds = array<i64: 32, 1>}, {pipeline_mode = #tpu.pipeline_mode<synchronous>, transform_indices = @transform_14, window_bounds = array<i64: 4, 32>}, {pipeline_mode = #tpu.pipeline_mode<synchronous>, transform_indices = @transform_15, window_bounds = array<i64: 4, 1>}, {pipeline_mode = #tpu.pipeline_mode<synchronous>, transform_indices = @transform_16, window_bounds = array<i64: 128, 96>}, {pipeline_mode = #tpu.pipeline_mode<synchronous>, transform_indices = @transform_17, window_bounds = array<i64: 4, 4>}, {pipeline_mode = #tpu.pipeline_mode<synchronous>, transform_indices = @transform_18, window_bounds = array<i64: 2, 64>}, {pipeline_mode = #tpu.pipeline_mode<synchronous>, transform_indices = @transform_19, window_bounds = array<i64: 9, 128>}, {pipeline_mode = #tpu.pipeline_mode<synchronous>, transform_indices = @transform_20, window_bounds = array<i64: 8, 96>}, {transform_indices = @transform_21, window_bounds = array<i64: 1, 4, 96>}]} {
    %c0 = arith.constant 0 : index
    %c0_0 = arith.constant 0 : index
    %0 = vector.load %arg3[%c0, %c0_0] : memref<2x8xbf16, #tpu.memory_space<vmem>>, vector<2x8xbf16>
    %c0_1 = arith.constant 0 : index
    %c0_2 = arith.constant 0 : index
    %c0_3 = arith.constant 0 : index
    %1 = vector.load %arg1[%c0_1, %c0_2, %c0_3] : memref<1x8x64xf32, #tpu.memory_space<vmem>>, vector<1x8x64xf32>
    %2 = vector.shape_cast %1 : vector<1x8x64xf32> to vector<8x64xf32>
    %3 = arith.truncf %2 : vector<8x64xf32> to vector<8x64xbf16>
    %cst = arith.constant dense<0.000000e+00> : vector<2x64xf32>
    %4 = tpu.matmul %0, %3, %cst {dimension_numbers = #tpu.dot_dimension_numbers<[1], [0], [0], [1], [0, 0, 1, 1], [], []>} : vector<2x8xbf16>, vector<8x64xbf16>, vector<2x64xf32> -> vector<2x64xf32>
    %c0_4 = arith.constant 0 : index
    %c0_5 = arith.constant 0 : index
    %5 = vector.load %arg4[%c0_4, %c0_5] : memref<2x1xf32, #tpu.memory_space<vmem>>, vector<2x1xf32>
    %6 = vector.broadcast %5 : vector<2x1xf32> to vector<2x64xf32>
    %7 = arith.addf %4, %6 : vector<2x64xf32>
    %cst_6 = arith.constant 0.000000e+00 : f32
    %8 = vector.broadcast %cst_6 : f32 to vector<2x64xf32>
    %9 = arith.maximumf %7, %8 : vector<2x64xf32>
    %c0_7 = arith.constant 0 : index
    %c0_8 = arith.constant 0 : index
    %10 = vector.load %arg19[%c0_7, %c0_8] : memref<2x64xf32, #tpu.memory_space<vmem>>, vector<2x64xf32>
    %11 = vector.extract_strided_slice %10 {offsets = [0, 0], sizes = [1, 64], strides = [1, 1]} : vector<2x64xf32> to vector<1x64xf32>
    %c1_i32 = arith.constant 1 : i32
    %12 = tpu.dynamic_rotate %9 by %c1_i32 dim 1 : vector<2x64xf32>, i32 -> vector<2x64xf32>
    %13 = vector.broadcast %11 : vector<1x64xf32> to vector<2x64xf32>
    %14 = arith.mulf %12, %13 : vector<2x64xf32>
    %15 = vector.extract_strided_slice %10 {offsets = [1, 0], sizes = [1, 64], strides = [1, 1]} : vector<2x64xf32> to vector<1x64xf32>
    %c63_i32 = arith.constant 63 : i32
    %16 = tpu.dynamic_rotate %9 by %c63_i32 dim 1 : vector<2x64xf32>, i32 -> vector<2x64xf32>
    %17 = vector.broadcast %15 : vector<1x64xf32> to vector<2x64xf32>
    %18 = arith.mulf %16, %17 : vector<2x64xf32>
    %c0_9 = arith.constant 0 : index
    %c0_10 = arith.constant 0 : index
    %19 = vector.load %arg5[%c0_9, %c0_10] : memref<4x6xbf16, #tpu.memory_space<vmem>>, vector<4x6xbf16>
    %20 = tpu.concatenate %9, %14, %18 in 0 : vector<2x64xf32>, vector<2x64xf32>, vector<2x64xf32> -> vector<6x64xf32>
    %21 = arith.truncf %20 : vector<6x64xf32> to vector<6x64xbf16>
    %cst_11 = arith.constant dense<0.000000e+00> : vector<4x64xf32>
    %22 = tpu.matmul %19, %21, %cst_11 {dimension_numbers = #tpu.dot_dimension_numbers<[1], [0], [0], [1], [0, 0, 1, 1], [], []>} : vector<4x6xbf16>, vector<6x64xbf16>, vector<4x64xf32> -> vector<4x64xf32>
    %c0_12 = arith.constant 0 : index
    %c0_13 = arith.constant 0 : index
    %23 = vector.load %arg6[%c0_12, %c0_13] : memref<4x1xf32, #tpu.memory_space<vmem>>, vector<4x1xf32>
    %24 = vector.broadcast %23 : vector<4x1xf32> to vector<4x64xf32>
    %25 = arith.addf %22, %24 : vector<4x64xf32>
    %cst_14 = arith.constant 0.000000e+00 : f32
    %26 = vector.broadcast %cst_14 : f32 to vector<4x64xf32>
    %27 = arith.maximumf %25, %26 : vector<4x64xf32>
    %28 = vector.extract_strided_slice %27 {offsets = [0, 0], sizes = [2, 64], strides = [1, 1]} : vector<4x64xf32> to vector<2x64xf32>
    %c0_15 = arith.constant 0 : index
    %c0_16 = arith.constant 0 : index
    %29 = vector.load %arg7[%c0_15, %c0_16] : memref<64x128xbf16, #tpu.memory_space<vmem>>, vector<64x128xbf16>
    %30 = arith.truncf %28 : vector<2x64xf32> to vector<2x64xbf16>
    %cst_17 = arith.constant dense<0.000000e+00> : vector<2x128xf32>
    %31 = tpu.matmul %30, %29, %cst_17 {dimension_numbers = #tpu.dot_dimension_numbers<[1], [0], [0], [1], [0, 0, 1, 1], [], []>} : vector<2x64xbf16>, vector<64x128xbf16>, vector<2x128xf32> -> vector<2x128xf32>
    %32 = vector.extract_strided_slice %27 {offsets = [2, 0], sizes = [2, 64], strides = [1, 1]} : vector<4x64xf32> to vector<2x64xf32>
    %c0_18 = arith.constant 0 : index
    %c0_19 = arith.constant 0 : index
    %33 = vector.load %arg8[%c0_18, %c0_19] : memref<64x128xbf16, #tpu.memory_space<vmem>>, vector<64x128xbf16>
    %34 = arith.truncf %32 : vector<2x64xf32> to vector<2x64xbf16>
    %cst_20 = arith.constant dense<0.000000e+00> : vector<2x128xf32>
    %35 = tpu.matmul %34, %33, %cst_20 {dimension_numbers = #tpu.dot_dimension_numbers<[1], [0], [0], [1], [0, 0, 1, 1], [], []>} : vector<2x64xbf16>, vector<64x128xbf16>, vector<2x128xf32> -> vector<2x128xf32>
    %36 = arith.addf %31, %35 : vector<2x128xf32>
    %c0_21 = arith.constant 0 : index
    %c0_22 = arith.constant 0 : index
    %37 = vector.load %arg20[%c0_21, %c0_22] : memref<9x128xf32, #tpu.memory_space<vmem>>, vector<9x128xf32>
    %38 = vector.extract_strided_slice %37 {offsets = [0, 0], sizes = [1, 128], strides = [1, 1]} : vector<9x128xf32> to vector<1x128xf32>
    %c17_i32 = arith.constant 17 : i32
    %39 = tpu.dynamic_rotate %36 by %c17_i32 dim 1 : vector<2x128xf32>, i32 -> vector<2x128xf32>
    %40 = vector.broadcast %38 : vector<1x128xf32> to vector<2x128xf32>
    %41 = arith.mulf %39, %40 : vector<2x128xf32>
    %42 = vector.extract_strided_slice %37 {offsets = [1, 0], sizes = [1, 128], strides = [1, 1]} : vector<9x128xf32> to vector<1x128xf32>
    %c16_i32 = arith.constant 16 : i32
    %43 = tpu.dynamic_rotate %36 by %c16_i32 dim 1 : vector<2x128xf32>, i32 -> vector<2x128xf32>
    %44 = vector.broadcast %42 : vector<1x128xf32> to vector<2x128xf32>
    %45 = arith.mulf %43, %44 : vector<2x128xf32>
    %46 = vector.extract_strided_slice %37 {offsets = [2, 0], sizes = [1, 128], strides = [1, 1]} : vector<9x128xf32> to vector<1x128xf32>
    %c15_i32 = arith.constant 15 : i32
    %47 = tpu.dynamic_rotate %36 by %c15_i32 dim 1 : vector<2x128xf32>, i32 -> vector<2x128xf32>
    %48 = vector.broadcast %46 : vector<1x128xf32> to vector<2x128xf32>
    %49 = arith.mulf %47, %48 : vector<2x128xf32>
    %50 = vector.extract_strided_slice %37 {offsets = [3, 0], sizes = [1, 128], strides = [1, 1]} : vector<9x128xf32> to vector<1x128xf32>
    %c1_i32_23 = arith.constant 1 : i32
    %51 = tpu.dynamic_rotate %36 by %c1_i32_23 dim 1 : vector<2x128xf32>, i32 -> vector<2x128xf32>
    %52 = vector.broadcast %50 : vector<1x128xf32> to vector<2x128xf32>
    %53 = arith.mulf %51, %52 : vector<2x128xf32>
    %54 = vector.extract_strided_slice %37 {offsets = [5, 0], sizes = [1, 128], strides = [1, 1]} : vector<9x128xf32> to vector<1x128xf32>
    %c127_i32 = arith.constant 127 : i32
    %55 = tpu.dynamic_rotate %36 by %c127_i32 dim 1 : vector<2x128xf32>, i32 -> vector<2x128xf32>
    %56 = vector.broadcast %54 : vector<1x128xf32> to vector<2x128xf32>
    %57 = arith.mulf %55, %56 : vector<2x128xf32>
    %58 = vector.extract_strided_slice %37 {offsets = [6, 0], sizes = [1, 128], strides = [1, 1]} : vector<9x128xf32> to vector<1x128xf32>
    %c113_i32 = arith.constant 113 : i32
    %59 = tpu.dynamic_rotate %36 by %c113_i32 dim 1 : vector<2x128xf32>, i32 -> vector<2x128xf32>
    %60 = vector.broadcast %58 : vector<1x128xf32> to vector<2x128xf32>
    %61 = arith.mulf %59, %60 : vector<2x128xf32>
    %62 = vector.extract_strided_slice %37 {offsets = [7, 0], sizes = [1, 128], strides = [1, 1]} : vector<9x128xf32> to vector<1x128xf32>
    %c112_i32 = arith.constant 112 : i32
    %63 = tpu.dynamic_rotate %36 by %c112_i32 dim 1 : vector<2x128xf32>, i32 -> vector<2x128xf32>
    %64 = vector.broadcast %62 : vector<1x128xf32> to vector<2x128xf32>
    %65 = arith.mulf %63, %64 : vector<2x128xf32>
    %66 = vector.extract_strided_slice %37 {offsets = [8, 0], sizes = [1, 128], strides = [1, 1]} : vector<9x128xf32> to vector<1x128xf32>
    %c111_i32 = arith.constant 111 : i32
    %67 = tpu.dynamic_rotate %36 by %c111_i32 dim 1 : vector<2x128xf32>, i32 -> vector<2x128xf32>
    %68 = vector.broadcast %66 : vector<1x128xf32> to vector<2x128xf32>
    %69 = arith.mulf %67, %68 : vector<2x128xf32>
    %70 = tpu.concatenate %41, %45, %49, %53, %36, %57, %61, %65, %69 in 0 : vector<2x128xf32>, vector<2x128xf32>, vector<2x128xf32>, vector<2x128xf32>, vector<2x128xf32>, vector<2x128xf32>, vector<2x128xf32>, vector<2x128xf32>, vector<2x128xf32> -> vector<18x128xf32>
    %c0_24 = arith.constant 0 : index
    %c0_25 = arith.constant 0 : index
    %71 = vector.load %arg9[%c0_24, %c0_25] : memref<32x18xbf16, #tpu.memory_space<vmem>>, vector<32x18xbf16>
    %72 = arith.truncf %70 : vector<18x128xf32> to vector<18x128xbf16>
    %cst_26 = arith.constant dense<0.000000e+00> : vector<32x128xf32>
    %73 = tpu.matmul %71, %72, %cst_26 {dimension_numbers = #tpu.dot_dimension_numbers<[1], [0], [0], [1], [0, 0, 1, 1], [], []>} : vector<32x18xbf16>, vector<18x128xbf16>, vector<32x128xf32> -> vector<32x128xf32>
    %c0_27 = arith.constant 0 : index
    %c0_28 = arith.constant 0 : index
    %74 = vector.load %arg10[%c0_27, %c0_28] : memref<32x1xf32, #tpu.memory_space<vmem>>, vector<32x1xf32>
    %75 = vector.broadcast %74 : vector<32x1xf32> to vector<32x128xf32>
    %76 = arith.addf %73, %75 : vector<32x128xf32>
    %cst_29 = arith.constant 0.000000e+00 : f32
    %77 = vector.broadcast %cst_29 : f32 to vector<32x128xf32>
    %78 = arith.maximumf %76, %77 : vector<32x128xf32>
    %c0_30 = arith.constant 0 : index
    %c0_31 = arith.constant 0 : index
    %79 = vector.load %arg11[%c0_30, %c0_31] : memref<2x32xbf16, #tpu.memory_space<vmem>>, vector<2x32xbf16>
    %80 = arith.truncf %78 : vector<32x128xf32> to vector<32x128xbf16>
    %cst_32 = arith.constant dense<0.000000e+00> : vector<2x128xf32>
    %81 = tpu.matmul %79, %80, %cst_32 {dimension_numbers = #tpu.dot_dimension_numbers<[1], [0], [0], [1], [0, 0, 1, 1], [], []>} : vector<2x32xbf16>, vector<32x128xbf16>, vector<2x128xf32> -> vector<2x128xf32>
    %c0_33 = arith.constant 0 : index
    %c0_34 = arith.constant 0 : index
    %82 = vector.load %arg12[%c0_33, %c0_34] : memref<2x1xf32, #tpu.memory_space<vmem>>, vector<2x1xf32>
    %83 = vector.broadcast %82 : vector<2x1xf32> to vector<2x128xf32>
    %84 = arith.addf %81, %83 : vector<2x128xf32>
    %cst_35 = arith.constant 0.000000e+00 : f32
    %85 = vector.broadcast %cst_35 : f32 to vector<2x128xf32>
    %86 = arith.maximumf %84, %85 : vector<2x128xf32>
    %87 = vector.extract_strided_slice %37 {offsets = [0, 0], sizes = [1, 128], strides = [1, 1]} : vector<9x128xf32> to vector<1x128xf32>
    %c17_i32_36 = arith.constant 17 : i32
    %88 = tpu.dynamic_rotate %86 by %c17_i32_36 dim 1 : vector<2x128xf32>, i32 -> vector<2x128xf32>
    %89 = vector.broadcast %87 : vector<1x128xf32> to vector<2x128xf32>
    %90 = arith.mulf %88, %89 : vector<2x128xf32>
    %91 = vector.extract_strided_slice %37 {offsets = [1, 0], sizes = [1, 128], strides = [1, 1]} : vector<9x128xf32> to vector<1x128xf32>
    %c16_i32_37 = arith.constant 16 : i32
    %92 = tpu.dynamic_rotate %86 by %c16_i32_37 dim 1 : vector<2x128xf32>, i32 -> vector<2x128xf32>
    %93 = vector.broadcast %91 : vector<1x128xf32> to vector<2x128xf32>
    %94 = arith.mulf %92, %93 : vector<2x128xf32>
    %95 = vector.extract_strided_slice %37 {offsets = [2, 0], sizes = [1, 128], strides = [1, 1]} : vector<9x128xf32> to vector<1x128xf32>
    %c15_i32_38 = arith.constant 15 : i32
    %96 = tpu.dynamic_rotate %86 by %c15_i32_38 dim 1 : vector<2x128xf32>, i32 -> vector<2x128xf32>
    %97 = vector.broadcast %95 : vector<1x128xf32> to vector<2x128xf32>
    %98 = arith.mulf %96, %97 : vector<2x128xf32>
    %99 = vector.extract_strided_slice %37 {offsets = [3, 0], sizes = [1, 128], strides = [1, 1]} : vector<9x128xf32> to vector<1x128xf32>
    %c1_i32_39 = arith.constant 1 : i32
    %100 = tpu.dynamic_rotate %86 by %c1_i32_39 dim 1 : vector<2x128xf32>, i32 -> vector<2x128xf32>
    %101 = vector.broadcast %99 : vector<1x128xf32> to vector<2x128xf32>
    %102 = arith.mulf %100, %101 : vector<2x128xf32>
    %103 = vector.extract_strided_slice %37 {offsets = [5, 0], sizes = [1, 128], strides = [1, 1]} : vector<9x128xf32> to vector<1x128xf32>
    %c127_i32_40 = arith.constant 127 : i32
    %104 = tpu.dynamic_rotate %86 by %c127_i32_40 dim 1 : vector<2x128xf32>, i32 -> vector<2x128xf32>
    %105 = vector.broadcast %103 : vector<1x128xf32> to vector<2x128xf32>
    %106 = arith.mulf %104, %105 : vector<2x128xf32>
    %107 = vector.extract_strided_slice %37 {offsets = [6, 0], sizes = [1, 128], strides = [1, 1]} : vector<9x128xf32> to vector<1x128xf32>
    %c113_i32_41 = arith.constant 113 : i32
    %108 = tpu.dynamic_rotate %86 by %c113_i32_41 dim 1 : vector<2x128xf32>, i32 -> vector<2x128xf32>
    %109 = vector.broadcast %107 : vector<1x128xf32> to vector<2x128xf32>
    %110 = arith.mulf %108, %109 : vector<2x128xf32>
    %111 = vector.extract_strided_slice %37 {offsets = [7, 0], sizes = [1, 128], strides = [1, 1]} : vector<9x128xf32> to vector<1x128xf32>
    %c112_i32_42 = arith.constant 112 : i32
    %112 = tpu.dynamic_rotate %86 by %c112_i32_42 dim 1 : vector<2x128xf32>, i32 -> vector<2x128xf32>
    %113 = vector.broadcast %111 : vector<1x128xf32> to vector<2x128xf32>
    %114 = arith.mulf %112, %113 : vector<2x128xf32>
    %115 = vector.extract_strided_slice %37 {offsets = [8, 0], sizes = [1, 128], strides = [1, 1]} : vector<9x128xf32> to vector<1x128xf32>
    %c111_i32_43 = arith.constant 111 : i32
    %116 = tpu.dynamic_rotate %86 by %c111_i32_43 dim 1 : vector<2x128xf32>, i32 -> vector<2x128xf32>
    %117 = vector.broadcast %115 : vector<1x128xf32> to vector<2x128xf32>
    %118 = arith.mulf %116, %117 : vector<2x128xf32>
    %119 = tpu.concatenate %90, %94, %98, %102, %86, %106, %110, %114, %118 in 0 : vector<2x128xf32>, vector<2x128xf32>, vector<2x128xf32>, vector<2x128xf32>, vector<2x128xf32>, vector<2x128xf32>, vector<2x128xf32>, vector<2x128xf32>, vector<2x128xf32> -> vector<18x128xf32>
    %c0_44 = arith.constant 0 : index
    %c0_45 = arith.constant 0 : index
    %120 = vector.load %arg13[%c0_44, %c0_45] : memref<32x18xbf16, #tpu.memory_space<vmem>>, vector<32x18xbf16>
    %121 = arith.truncf %119 : vector<18x128xf32> to vector<18x128xbf16>
    %cst_46 = arith.constant dense<0.000000e+00> : vector<32x128xf32>
    %122 = tpu.matmul %120, %121, %cst_46 {dimension_numbers = #tpu.dot_dimension_numbers<[1], [0], [0], [1], [0, 0, 1, 1], [], []>} : vector<32x18xbf16>, vector<18x128xbf16>, vector<32x128xf32> -> vector<32x128xf32>
    %c0_47 = arith.constant 0 : index
    %c0_48 = arith.constant 0 : index
    %123 = vector.load %arg14[%c0_47, %c0_48] : memref<32x1xf32, #tpu.memory_space<vmem>>, vector<32x1xf32>
    %124 = vector.broadcast %123 : vector<32x1xf32> to vector<32x128xf32>
    %125 = arith.addf %122, %124 : vector<32x128xf32>
    %cst_49 = arith.constant 0.000000e+00 : f32
    %126 = vector.broadcast %cst_49 : f32 to vector<32x128xf32>
    %127 = arith.maximumf %125, %126 : vector<32x128xf32>
    %c0_50 = arith.constant 0 : index
    %c0_51 = arith.constant 0 : index
    %128 = vector.load %arg15[%c0_50, %c0_51] : memref<4x32xbf16, #tpu.memory_space<vmem>>, vector<4x32xbf16>
    %129 = arith.truncf %127 : vector<32x128xf32> to vector<32x128xbf16>
    %cst_52 = arith.constant dense<0.000000e+00> : vector<4x128xf32>
    %130 = tpu.matmul %128, %129, %cst_52 {dimension_numbers = #tpu.dot_dimension_numbers<[1], [0], [0], [1], [0, 0, 1, 1], [], []>} : vector<4x32xbf16>, vector<32x128xbf16>, vector<4x128xf32> -> vector<4x128xf32>
    %c0_53 = arith.constant 0 : index
    %c0_54 = arith.constant 0 : index
    %131 = vector.load %arg16[%c0_53, %c0_54] : memref<4x1xf32, #tpu.memory_space<vmem>>, vector<4x1xf32>
    %132 = vector.broadcast %131 : vector<4x1xf32> to vector<4x128xf32>
    %133 = arith.addf %130, %132 : vector<4x128xf32>
    %c0_55 = arith.constant 0 : index
    %c0_56 = arith.constant 0 : index
    %134 = vector.load %arg17[%c0_55, %c0_56] : memref<128x96xf32, #tpu.memory_space<vmem>>, vector<128x96xf32>
    %cst_57 = arith.constant dense<0.000000e+00> : vector<4x96xf32>
    %135 = tpu.matmul %133, %134, %cst_57 {dimension_numbers = #tpu.dot_dimension_numbers<[1], [0], [0], [1], [0, 0, 1, 1], [], []>} : vector<4x128xf32>, vector<128x96xf32>, vector<4x96xf32> -> vector<4x96xf32>
    %c0_58 = arith.constant 0 : index
    %c0_59 = arith.constant 0 : index
    %c0_60 = arith.constant 0 : index
    %136 = vector.load %arg2[%c0_58, %c0_59, %c0_60] : memref<1x3x96xf32, #tpu.memory_space<vmem>>, vector<1x3x96xf32>
    %137 = vector.shape_cast %136 : vector<1x3x96xf32> to vector<3x96xf32>
    %c0_61 = arith.constant 0 : index
    %c0_62 = arith.constant 0 : index
    %138 = vector.load %arg21[%c0_61, %c0_62] : memref<8x96xf32, #tpu.memory_space<vmem>>, vector<8x96xf32>
    %c13_i32 = arith.constant 13 : i32
    %139 = tpu.dynamic_rotate %137 by %c13_i32 dim 1 : vector<3x96xf32>, i32 -> vector<3x96xf32>
    %140 = arith.subf %137, %139 : vector<3x96xf32>
    %141 = arith.mulf %140, %140 : vector<3x96xf32>
    %cst_63 = arith.constant dense<0.000000e+00> : vector<96xf32>
    %142 = vector.multi_reduction <add>, %141, %cst_63 [0] : vector<3x96xf32> to vector<96xf32>
    %143 = vector.shape_cast %142 : vector<96xf32> to vector<1x96xf32>
    %144 = vector.extract_strided_slice %138 {offsets = [0, 0], sizes = [1, 96], strides = [1, 1]} : vector<8x96xf32> to vector<1x96xf32>
    %cst_64 = arith.constant 0.000000e+00 : f32
    %145 = vector.broadcast %cst_64 : f32 to vector<1x96xf32>
    %146 = arith.subf %145, %143 : vector<1x96xf32>
    %cst_65 = arith.constant 0.888888895 : f32
    %147 = vector.broadcast %cst_65 : f32 to vector<1x96xf32>
    %148 = arith.mulf %146, %147 : vector<1x96xf32>
    %149 = math.exp %148 : vector<1x96xf32>
    %150 = arith.mulf %144, %149 : vector<1x96xf32>
    %c12_i32 = arith.constant 12 : i32
    %151 = tpu.dynamic_rotate %137 by %c12_i32 dim 1 : vector<3x96xf32>, i32 -> vector<3x96xf32>
    %152 = arith.subf %137, %151 : vector<3x96xf32>
    %153 = arith.mulf %152, %152 : vector<3x96xf32>
    %cst_66 = arith.constant dense<0.000000e+00> : vector<96xf32>
    %154 = vector.multi_reduction <add>, %153, %cst_66 [0] : vector<3x96xf32> to vector<96xf32>
    %155 = vector.shape_cast %154 : vector<96xf32> to vector<1x96xf32>
    %156 = vector.extract_strided_slice %138 {offsets = [1, 0], sizes = [1, 96], strides = [1, 1]} : vector<8x96xf32> to vector<1x96xf32>
    %cst_67 = arith.constant 0.000000e+00 : f32
    %157 = vector.broadcast %cst_67 : f32 to vector<1x96xf32>
    %158 = arith.subf %157, %155 : vector<1x96xf32>
    %cst_68 = arith.constant 0.888888895 : f32
    %159 = vector.broadcast %cst_68 : f32 to vector<1x96xf32>
    %160 = arith.mulf %158, %159 : vector<1x96xf32>
    %161 = math.exp %160 : vector<1x96xf32>
    %162 = arith.mulf %156, %161 : vector<1x96xf32>
    %c11_i32 = arith.constant 11 : i32
    %163 = tpu.dynamic_rotate %137 by %c11_i32 dim 1 : vector<3x96xf32>, i32 -> vector<3x96xf32>
    %164 = arith.subf %137, %163 : vector<3x96xf32>
    %165 = arith.mulf %164, %164 : vector<3x96xf32>
    %cst_69 = arith.constant dense<0.000000e+00> : vector<96xf32>
    %166 = vector.multi_reduction <add>, %165, %cst_69 [0] : vector<3x96xf32> to vector<96xf32>
    %167 = vector.shape_cast %166 : vector<96xf32> to vector<1x96xf32>
    %168 = vector.extract_strided_slice %138 {offsets = [2, 0], sizes = [1, 96], strides = [1, 1]} : vector<8x96xf32> to vector<1x96xf32>
    %cst_70 = arith.constant 0.000000e+00 : f32
    %169 = vector.broadcast %cst_70 : f32 to vector<1x96xf32>
    %170 = arith.subf %169, %167 : vector<1x96xf32>
    %cst_71 = arith.constant 0.888888895 : f32
    %171 = vector.broadcast %cst_71 : f32 to vector<1x96xf32>
    %172 = arith.mulf %170, %171 : vector<1x96xf32>
    %173 = math.exp %172 : vector<1x96xf32>
    %174 = arith.mulf %168, %173 : vector<1x96xf32>
    %c1_i32_72 = arith.constant 1 : i32
    %175 = tpu.dynamic_rotate %137 by %c1_i32_72 dim 1 : vector<3x96xf32>, i32 -> vector<3x96xf32>
    %176 = arith.subf %137, %175 : vector<3x96xf32>
    %177 = arith.mulf %176, %176 : vector<3x96xf32>
    %cst_73 = arith.constant dense<0.000000e+00> : vector<96xf32>
    %178 = vector.multi_reduction <add>, %177, %cst_73 [0] : vector<3x96xf32> to vector<96xf32>
    %179 = vector.shape_cast %178 : vector<96xf32> to vector<1x96xf32>
    %180 = vector.extract_strided_slice %138 {offsets = [3, 0], sizes = [1, 96], strides = [1, 1]} : vector<8x96xf32> to vector<1x96xf32>
    %cst_74 = arith.constant 0.000000e+00 : f32
    %181 = vector.broadcast %cst_74 : f32 to vector<1x96xf32>
    %182 = arith.subf %181, %179 : vector<1x96xf32>
    %cst_75 = arith.constant 0.888888895 : f32
    %183 = vector.broadcast %cst_75 : f32 to vector<1x96xf32>
    %184 = arith.mulf %182, %183 : vector<1x96xf32>
    %185 = math.exp %184 : vector<1x96xf32>
    %186 = arith.mulf %180, %185 : vector<1x96xf32>
    %c95_i32 = arith.constant 95 : i32
    %187 = tpu.dynamic_rotate %137 by %c95_i32 dim 1 : vector<3x96xf32>, i32 -> vector<3x96xf32>
    %188 = arith.subf %137, %187 : vector<3x96xf32>
    %189 = arith.mulf %188, %188 : vector<3x96xf32>
    %cst_76 = arith.constant dense<0.000000e+00> : vector<96xf32>
    %190 = vector.multi_reduction <add>, %189, %cst_76 [0] : vector<3x96xf32> to vector<96xf32>
    %191 = vector.shape_cast %190 : vector<96xf32> to vector<1x96xf32>
    %192 = vector.extract_strided_slice %138 {offsets = [4, 0], sizes = [1, 96], strides = [1, 1]} : vector<8x96xf32> to vector<1x96xf32>
    %cst_77 = arith.constant 0.000000e+00 : f32
    %193 = vector.broadcast %cst_77 : f32 to vector<1x96xf32>
    %194 = arith.subf %193, %191 : vector<1x96xf32>
    %cst_78 = arith.constant 0.888888895 : f32
    %195 = vector.broadcast %cst_78 : f32 to vector<1x96xf32>
    %196 = arith.mulf %194, %195 : vector<1x96xf32>
    %197 = math.exp %196 : vector<1x96xf32>
    %198 = arith.mulf %192, %197 : vector<1x96xf32>
    %c85_i32 = arith.constant 85 : i32
    %199 = tpu.dynamic_rotate %137 by %c85_i32 dim 1 : vector<3x96xf32>, i32 -> vector<3x96xf32>
    %200 = arith.subf %137, %199 : vector<3x96xf32>
    %201 = arith.mulf %200, %200 : vector<3x96xf32>
    %cst_79 = arith.constant dense<0.000000e+00> : vector<96xf32>
    %202 = vector.multi_reduction <add>, %201, %cst_79 [0] : vector<3x96xf32> to vector<96xf32>
    %203 = vector.shape_cast %202 : vector<96xf32> to vector<1x96xf32>
    %204 = vector.extract_strided_slice %138 {offsets = [5, 0], sizes = [1, 96], strides = [1, 1]} : vector<8x96xf32> to vector<1x96xf32>
    %cst_80 = arith.constant 0.000000e+00 : f32
    %205 = vector.broadcast %cst_80 : f32 to vector<1x96xf32>
    %206 = arith.subf %205, %203 : vector<1x96xf32>
    %cst_81 = arith.constant 0.888888895 : f32
    %207 = vector.broadcast %cst_81 : f32 to vector<1x96xf32>
    %208 = arith.mulf %206, %207 : vector<1x96xf32>
    %209 = math.exp %208 : vector<1x96xf32>
    %210 = arith.mulf %204, %209 : vector<1x96xf32>
    %c84_i32 = arith.constant 84 : i32
    %211 = tpu.dynamic_rotate %137 by %c84_i32 dim 1 : vector<3x96xf32>, i32 -> vector<3x96xf32>
    %212 = arith.subf %137, %211 : vector<3x96xf32>
    %213 = arith.mulf %212, %212 : vector<3x96xf32>
    %cst_82 = arith.constant dense<0.000000e+00> : vector<96xf32>
    %214 = vector.multi_reduction <add>, %213, %cst_82 [0] : vector<3x96xf32> to vector<96xf32>
    %215 = vector.shape_cast %214 : vector<96xf32> to vector<1x96xf32>
    %216 = vector.extract_strided_slice %138 {offsets = [6, 0], sizes = [1, 96], strides = [1, 1]} : vector<8x96xf32> to vector<1x96xf32>
    %cst_83 = arith.constant 0.000000e+00 : f32
    %217 = vector.broadcast %cst_83 : f32 to vector<1x96xf32>
    %218 = arith.subf %217, %215 : vector<1x96xf32>
    %cst_84 = arith.constant 0.888888895 : f32
    %219 = vector.broadcast %cst_84 : f32 to vector<1x96xf32>
    %220 = arith.mulf %218, %219 : vector<1x96xf32>
    %221 = math.exp %220 : vector<1x96xf32>
    %222 = arith.mulf %216, %221 : vector<1x96xf32>
    %c83_i32 = arith.constant 83 : i32
    %223 = tpu.dynamic_rotate %137 by %c83_i32 dim 1 : vector<3x96xf32>, i32 -> vector<3x96xf32>
    %224 = arith.subf %137, %223 : vector<3x96xf32>
    %225 = arith.mulf %224, %224 : vector<3x96xf32>
    %cst_85 = arith.constant dense<0.000000e+00> : vector<96xf32>
    %226 = vector.multi_reduction <add>, %225, %cst_85 [0] : vector<3x96xf32> to vector<96xf32>
    %227 = vector.shape_cast %226 : vector<96xf32> to vector<1x96xf32>
    %228 = vector.extract_strided_slice %138 {offsets = [7, 0], sizes = [1, 96], strides = [1, 1]} : vector<8x96xf32> to vector<1x96xf32>
    %cst_86 = arith.constant 0.000000e+00 : f32
    %229 = vector.broadcast %cst_86 : f32 to vector<1x96xf32>
    %230 = arith.subf %229, %227 : vector<1x96xf32>
    %cst_87 = arith.constant 0.888888895 : f32
    %231 = vector.broadcast %cst_87 : f32 to vector<1x96xf32>
    %232 = arith.mulf %230, %231 : vector<1x96xf32>
    %233 = math.exp %232 : vector<1x96xf32>
    %234 = arith.mulf %228, %233 : vector<1x96xf32>
    %c0_88 = arith.constant 0 : index
    %c0_89 = arith.constant 0 : index
    %235 = vector.load %arg18[%c0_88, %c0_89] : memref<4x4xf32, #tpu.memory_space<vmem>>, vector<4x4xf32>
    %cst_90 = arith.constant dense<0xFF800000> : vector<96xf32>
    %236 = vector.multi_reduction <maximumf>, %135, %cst_90 [0] : vector<4x96xf32> to vector<96xf32>
    %237 = vector.shape_cast %236 : vector<96xf32> to vector<1x96xf32>
    %238 = vector.broadcast %237 : vector<1x96xf32> to vector<4x96xf32>
    %239 = arith.subf %135, %238 : vector<4x96xf32>
    %240 = math.exp %239 : vector<4x96xf32>
    %cst_91 = arith.constant dense<0.000000e+00> : vector<96xf32>
    %241 = vector.multi_reduction <add>, %240, %cst_91 [0] : vector<4x96xf32> to vector<96xf32>
    %242 = vector.shape_cast %241 : vector<96xf32> to vector<1x96xf32>
    %243 = tpu.reciprocal %242 {approx = true} : vector<1x96xf32> -> vector<1x96xf32>
    %244 = vector.broadcast %243 : vector<1x96xf32> to vector<4x96xf32>
    %245 = arith.mulf %240, %244 : vector<4x96xf32>
    %c13_i32_92 = arith.constant 13 : i32
    %246 = tpu.dynamic_rotate %245 by %c13_i32_92 dim 1 : vector<4x96xf32>, i32 -> vector<4x96xf32>
    %247 = vector.broadcast %150 : vector<1x96xf32> to vector<4x96xf32>
    %248 = arith.mulf %247, %246 : vector<4x96xf32>
    %c12_i32_93 = arith.constant 12 : i32
    %249 = tpu.dynamic_rotate %245 by %c12_i32_93 dim 1 : vector<4x96xf32>, i32 -> vector<4x96xf32>
    %250 = vector.broadcast %162 : vector<1x96xf32> to vector<4x96xf32>
    %251 = arith.mulf %250, %249 : vector<4x96xf32>
    %252 = arith.addf %248, %251 : vector<4x96xf32>
    %c11_i32_94 = arith.constant 11 : i32
    %253 = tpu.dynamic_rotate %245 by %c11_i32_94 dim 1 : vector<4x96xf32>, i32 -> vector<4x96xf32>
    %254 = vector.broadcast %174 : vector<1x96xf32> to vector<4x96xf32>
    %255 = arith.mulf %254, %253 : vector<4x96xf32>
    %256 = arith.addf %252, %255 : vector<4x96xf32>
    %c1_i32_95 = arith.constant 1 : i32
    %257 = tpu.dynamic_rotate %245 by %c1_i32_95 dim 1 : vector<4x96xf32>, i32 -> vector<4x96xf32>
    %258 = vector.broadcast %186 : vector<1x96xf32> to vector<4x96xf32>
    %259 = arith.mulf %258, %257 : vector<4x96xf32>
    %260 = arith.addf %256, %259 : vector<4x96xf32>
    %c95_i32_96 = arith.constant 95 : i32
    %261 = tpu.dynamic_rotate %245 by %c95_i32_96 dim 1 : vector<4x96xf32>, i32 -> vector<4x96xf32>
    %262 = vector.broadcast %198 : vector<1x96xf32> to vector<4x96xf32>
    %263 = arith.mulf %262, %261 : vector<4x96xf32>
    %264 = arith.addf %260, %263 : vector<4x96xf32>
    %c85_i32_97 = arith.constant 85 : i32
    %265 = tpu.dynamic_rotate %245 by %c85_i32_97 dim 1 : vector<4x96xf32>, i32 -> vector<4x96xf32>
    %266 = vector.broadcast %210 : vector<1x96xf32> to vector<4x96xf32>
    %267 = arith.mulf %266, %265 : vector<4x96xf32>
    %268 = arith.addf %264, %267 : vector<4x96xf32>
    %c84_i32_98 = arith.constant 84 : i32
    %269 = tpu.dynamic_rotate %245 by %c84_i32_98 dim 1 : vector<4x96xf32>, i32 -> vector<4x96xf32>
    %270 = vector.broadcast %222 : vector<1x96xf32> to vector<4x96xf32>
    %271 = arith.mulf %270, %269 : vector<4x96xf32>
    %272 = arith.addf %268, %271 : vector<4x96xf32>
    %c83_i32_99 = arith.constant 83 : i32
    %273 = tpu.dynamic_rotate %245 by %c83_i32_99 dim 1 : vector<4x96xf32>, i32 -> vector<4x96xf32>
    %274 = vector.broadcast %234 : vector<1x96xf32> to vector<4x96xf32>
    %275 = arith.mulf %274, %273 : vector<4x96xf32>
    %276 = arith.addf %272, %275 : vector<4x96xf32>
    %cst_100 = arith.constant dense<0.000000e+00> : vector<4x96xf32>
    %277 = tpu.matmul %235, %276, %cst_100 {dimension_numbers = #tpu.dot_dimension_numbers<[1], [0], [0], [1], [0, 0, 1, 1], [], []>} : vector<4x4xf32>, vector<4x96xf32>, vector<4x96xf32> -> vector<4x96xf32>
    %278 = arith.subf %135, %277 : vector<4x96xf32>
    %cst_101 = arith.constant dense<0xFF800000> : vector<96xf32>
    %279 = vector.multi_reduction <maximumf>, %278, %cst_101 [0] : vector<4x96xf32> to vector<96xf32>
    %280 = vector.shape_cast %279 : vector<96xf32> to vector<1x96xf32>
    %281 = vector.broadcast %280 : vector<1x96xf32> to vector<4x96xf32>
    %282 = arith.subf %278, %281 : vector<4x96xf32>
    %283 = math.exp %282 : vector<4x96xf32>
    %cst_102 = arith.constant dense<0.000000e+00> : vector<96xf32>
    %284 = vector.multi_reduction <add>, %283, %cst_102 [0] : vector<4x96xf32> to vector<96xf32>
    %285 = vector.shape_cast %284 : vector<96xf32> to vector<1x96xf32>
    %286 = tpu.reciprocal %285 {approx = true} : vector<1x96xf32> -> vector<1x96xf32>
    %287 = vector.broadcast %286 : vector<1x96xf32> to vector<4x96xf32>
    %288 = arith.mulf %283, %287 : vector<4x96xf32>
    %c13_i32_103 = arith.constant 13 : i32
    %289 = tpu.dynamic_rotate %288 by %c13_i32_103 dim 1 : vector<4x96xf32>, i32 -> vector<4x96xf32>
    %290 = vector.broadcast %150 : vector<1x96xf32> to vector<4x96xf32>
    %291 = arith.mulf %290, %289 : vector<4x96xf32>
    %c12_i32_104 = arith.constant 12 : i32
    %292 = tpu.dynamic_rotate %288 by %c12_i32_104 dim 1 : vector<4x96xf32>, i32 -> vector<4x96xf32>
    %293 = vector.broadcast %162 : vector<1x96xf32> to vector<4x96xf32>
    %294 = arith.mulf %293, %292 : vector<4x96xf32>
    %295 = arith.addf %291, %294 : vector<4x96xf32>
    %c11_i32_105 = arith.constant 11 : i32
    %296 = tpu.dynamic_rotate %288 by %c11_i32_105 dim 1 : vector<4x96xf32>, i32 -> vector<4x96xf32>
    %297 = vector.broadcast %174 : vector<1x96xf32> to vector<4x96xf32>
    %298 = arith.mulf %297, %296 : vector<4x96xf32>
    %299 = arith.addf %295, %298 : vector<4x96xf32>
    %c1_i32_106 = arith.constant 1 : i32
    %300 = tpu.dynamic_rotate %288 by %c1_i32_106 dim 1 : vector<4x96xf32>, i32 -> vector<4x96xf32>
    %301 = vector.broadcast %186 : vector<1x96xf32> to vector<4x96xf32>
    %302 = arith.mulf %301, %300 : vector<4x96xf32>
    %303 = arith.addf %299, %302 : vector<4x96xf32>
    %c95_i32_107 = arith.constant 95 : i32
    %304 = tpu.dynamic_rotate %288 by %c95_i32_107 dim 1 : vector<4x96xf32>, i32 -> vector<4x96xf32>
    %305 = vector.broadcast %198 : vector<1x96xf32> to vector<4x96xf32>
    %306 = arith.mulf %305, %304 : vector<4x96xf32>
    %307 = arith.addf %303, %306 : vector<4x96xf32>
    %c85_i32_108 = arith.constant 85 : i32
    %308 = tpu.dynamic_rotate %288 by %c85_i32_108 dim 1 : vector<4x96xf32>, i32 -> vector<4x96xf32>
    %309 = vector.broadcast %210 : vector<1x96xf32> to vector<4x96xf32>
    %310 = arith.mulf %309, %308 : vector<4x96xf32>
    %311 = arith.addf %307, %310 : vector<4x96xf32>
    %c84_i32_109 = arith.constant 84 : i32
    %312 = tpu.dynamic_rotate %288 by %c84_i32_109 dim 1 : vector<4x96xf32>, i32 -> vector<4x96xf32>
    %313 = vector.broadcast %222 : vector<1x96xf32> to vector<4x96xf32>
    %314 = arith.mulf %313, %312 : vector<4x96xf32>
    %315 = arith.addf %311, %314 : vector<4x96xf32>
    %c83_i32_110 = arith.constant 83 : i32
    %316 = tpu.dynamic_rotate %288 by %c83_i32_110 dim 1 : vector<4x96xf32>, i32 -> vector<4x96xf32>
    %317 = vector.broadcast %234 : vector<1x96xf32> to vector<4x96xf32>
    %318 = arith.mulf %317, %316 : vector<4x96xf32>
    %319 = arith.addf %315, %318 : vector<4x96xf32>
    %cst_111 = arith.constant dense<0.000000e+00> : vector<4x96xf32>
    %320 = tpu.matmul %235, %319, %cst_111 {dimension_numbers = #tpu.dot_dimension_numbers<[1], [0], [0], [1], [0, 0, 1, 1], [], []>} : vector<4x4xf32>, vector<4x96xf32>, vector<4x96xf32> -> vector<4x96xf32>
    %321 = arith.subf %135, %320 : vector<4x96xf32>
    %cst_112 = arith.constant dense<0xFF800000> : vector<96xf32>
    %322 = vector.multi_reduction <maximumf>, %321, %cst_112 [0] : vector<4x96xf32> to vector<96xf32>
    %323 = vector.shape_cast %322 : vector<96xf32> to vector<1x96xf32>
    %324 = vector.broadcast %323 : vector<1x96xf32> to vector<4x96xf32>
    %325 = arith.subf %321, %324 : vector<4x96xf32>
    %326 = math.exp %325 : vector<4x96xf32>
    %cst_113 = arith.constant dense<0.000000e+00> : vector<96xf32>
    %327 = vector.multi_reduction <add>, %326, %cst_113 [0] : vector<4x96xf32> to vector<96xf32>
    %328 = vector.shape_cast %327 : vector<96xf32> to vector<1x96xf32>
    %329 = tpu.reciprocal %328 {approx = true} : vector<1x96xf32> -> vector<1x96xf32>
    %330 = vector.broadcast %329 : vector<1x96xf32> to vector<4x96xf32>
    %331 = arith.mulf %326, %330 : vector<4x96xf32>
    %c13_i32_114 = arith.constant 13 : i32
    %332 = tpu.dynamic_rotate %331 by %c13_i32_114 dim 1 : vector<4x96xf32>, i32 -> vector<4x96xf32>
    %333 = vector.broadcast %150 : vector<1x96xf32> to vector<4x96xf32>
    %334 = arith.mulf %333, %332 : vector<4x96xf32>
    %c12_i32_115 = arith.constant 12 : i32
    %335 = tpu.dynamic_rotate %331 by %c12_i32_115 dim 1 : vector<4x96xf32>, i32 -> vector<4x96xf32>
    %336 = vector.broadcast %162 : vector<1x96xf32> to vector<4x96xf32>
    %337 = arith.mulf %336, %335 : vector<4x96xf32>
    %338 = arith.addf %334, %337 : vector<4x96xf32>
    %c11_i32_116 = arith.constant 11 : i32
    %339 = tpu.dynamic_rotate %331 by %c11_i32_116 dim 1 : vector<4x96xf32>, i32 -> vector<4x96xf32>
    %340 = vector.broadcast %174 : vector<1x96xf32> to vector<4x96xf32>
    %341 = arith.mulf %340, %339 : vector<4x96xf32>
    %342 = arith.addf %338, %341 : vector<4x96xf32>
    %c1_i32_117 = arith.constant 1 : i32
    %343 = tpu.dynamic_rotate %331 by %c1_i32_117 dim 1 : vector<4x96xf32>, i32 -> vector<4x96xf32>
    %344 = vector.broadcast %186 : vector<1x96xf32> to vector<4x96xf32>
    %345 = arith.mulf %344, %343 : vector<4x96xf32>
    %346 = arith.addf %342, %345 : vector<4x96xf32>
    %c95_i32_118 = arith.constant 95 : i32
    %347 = tpu.dynamic_rotate %331 by %c95_i32_118 dim 1 : vector<4x96xf32>, i32 -> vector<4x96xf32>
    %348 = vector.broadcast %198 : vector<1x96xf32> to vector<4x96xf32>
    %349 = arith.mulf %348, %347 : vector<4x96xf32>
    %350 = arith.addf %346, %349 : vector<4x96xf32>
    %c85_i32_119 = arith.constant 85 : i32
    %351 = tpu.dynamic_rotate %331 by %c85_i32_119 dim 1 : vector<4x96xf32>, i32 -> vector<4x96xf32>
    %352 = vector.broadcast %210 : vector<1x96xf32> to vector<4x96xf32>
    %353 = arith.mulf %352, %351 : vector<4x96xf32>
    %354 = arith.addf %350, %353 : vector<4x96xf32>
    %c84_i32_120 = arith.constant 84 : i32
    %355 = tpu.dynamic_rotate %331 by %c84_i32_120 dim 1 : vector<4x96xf32>, i32 -> vector<4x96xf32>
    %356 = vector.broadcast %222 : vector<1x96xf32> to vector<4x96xf32>
    %357 = arith.mulf %356, %355 : vector<4x96xf32>
    %358 = arith.addf %354, %357 : vector<4x96xf32>
    %c83_i32_121 = arith.constant 83 : i32
    %359 = tpu.dynamic_rotate %331 by %c83_i32_121 dim 1 : vector<4x96xf32>, i32 -> vector<4x96xf32>
    %360 = vector.broadcast %234 : vector<1x96xf32> to vector<4x96xf32>
    %361 = arith.mulf %360, %359 : vector<4x96xf32>
    %362 = arith.addf %358, %361 : vector<4x96xf32>
    %cst_122 = arith.constant dense<0.000000e+00> : vector<4x96xf32>
    %363 = tpu.matmul %235, %362, %cst_122 {dimension_numbers = #tpu.dot_dimension_numbers<[1], [0], [0], [1], [0, 0, 1, 1], [], []>} : vector<4x4xf32>, vector<4x96xf32>, vector<4x96xf32> -> vector<4x96xf32>
    %364 = arith.subf %135, %363 : vector<4x96xf32>
    %c0_123 = arith.constant 0 : index
    %c0_124 = arith.constant 0 : index
    %c0_125 = arith.constant 0 : index
    %365 = vector.load %arg22[%c0_123, %c0_124, %c0_125] : memref<1x4x96xf32, #tpu.memory_space<vmem>>, vector<1x4x96xf32>
    %366 = vector.shape_cast %365 : vector<1x4x96xf32> to vector<4x96xf32>
    %367 = vector.shape_cast %364 : vector<4x96xf32> to vector<1x4x96xf32>
    tpu.vector_store %arg22[%c0_123, %c0_124, %c0_125], %367 {strides = array<i32>} : memref<1x4x96xf32, #tpu.memory_space<vmem>>, vector<1x4x96xf32>,
    return
  }
  func.func @transform_0(%arg0: i32) -> (i32, i32, i32) {
    %c0_i32 = arith.constant 0 : i32
    %c0_i32_0 = arith.constant 0 : i32
    %c0_i32_1 = arith.constant 0 : i32
    return %arg0, %c0_i32, %c0_i32_0 : i32, i32, i32
  }
  func.func @transform_1(%arg0: i32) -> (i32, i32, i32) {
    %c0_i32 = arith.constant 0 : i32
    %c0_i32_0 = arith.constant 0 : i32
    %c0_i32_1 = arith.constant 0 : i32
    return %arg0, %c0_i32, %c0_i32_0 : i32, i32, i32
  }
  func.func @transform_2(%arg0: i32) -> (i32, i32) {
    %c0_i32 = arith.constant 0 : i32
    %c0_i32_0 = arith.constant 0 : i32
    %c0_i32_1 = arith.constant 0 : i32
    return %c0_i32, %c0_i32_0 : i32, i32
  }
  func.func @transform_3(%arg0: i32) -> (i32, i32) {
    %c0_i32 = arith.constant 0 : i32
    %c0_i32_0 = arith.constant 0 : i32
    %c0_i32_1 = arith.constant 0 : i32
    return %c0_i32, %c0_i32_0 : i32, i32
  }
  func.func @transform_4(%arg0: i32) -> (i32, i32) {
    %c0_i32 = arith.constant 0 : i32
    %c0_i32_0 = arith.constant 0 : i32
    %c0_i32_1 = arith.constant 0 : i32
    return %c0_i32, %c0_i32_0 : i32, i32
  }
  func.func @transform_5(%arg0: i32) -> (i32, i32) {
    %c0_i32 = arith.constant 0 : i32
    %c0_i32_0 = arith.constant 0 : i32
    %c0_i32_1 = arith.constant 0 : i32
    return %c0_i32, %c0_i32_0 : i32, i32
  }
  func.func @transform_6(%arg0: i32) -> (i32, i32) {
    %c0_i32 = arith.constant 0 : i32
    %c0_i32_0 = arith.constant 0 : i32
    %c0_i32_1 = arith.constant 0 : i32
    return %c0_i32, %c0_i32_0 : i32, i32
  }
  func.func @transform_7(%arg0: i32) -> (i32, i32) {
    %c0_i32 = arith.constant 0 : i32
    %c0_i32_0 = arith.constant 0 : i32
    %c0_i32_1 = arith.constant 0 : i32
    return %c0_i32, %c0_i32_0 : i32, i32
  }
  func.func @transform_8(%arg0: i32) -> (i32, i32) {
    %c0_i32 = arith.constant 0 : i32
    %c0_i32_0 = arith.constant 0 : i32
    %c0_i32_1 = arith.constant 0 : i32
    return %c0_i32, %c0_i32_0 : i32, i32
  }
  func.func @transform_9(%arg0: i32) -> (i32, i32) {
    %c0_i32 = arith.constant 0 : i32
    %c0_i32_0 = arith.constant 0 : i32
    %c0_i32_1 = arith.constant 0 : i32
    return %c0_i32, %c0_i32_0 : i32, i32
  }
  func.func @transform_10(%arg0: i32) -> (i32, i32) {
    %c0_i32 = arith.constant 0 : i32
    %c0_i32_0 = arith.constant 0 : i32
    %c0_i32_1 = arith.constant 0 : i32
    return %c0_i32, %c0_i32_0 : i32, i32
  }
  func.func @transform_11(%arg0: i32) -> (i32, i32) {
    %c0_i32 = arith.constant 0 : i32
    %c0_i32_0 = arith.constant 0 : i32
    %c0_i32_1 = arith.constant 0 : i32
    return %c0_i32, %c0_i32_0 : i32, i32
  }
  func.func @transform_12(%arg0: i32) -> (i32, i32) {
    %c0_i32 = arith.constant 0 : i32
    %c0_i32_0 = arith.constant 0 : i32
    %c0_i32_1 = arith.constant 0 : i32
    return %c0_i32, %c0_i32_0 : i32, i32
  }
  func.func @transform_13(%arg0: i32) -> (i32, i32) {
    %c0_i32 = arith.constant 0 : i32
    %c0_i32_0 = arith.constant 0 : i32
    %c0_i32_1 = arith.constant 0 : i32
    return %c0_i32, %c0_i32_0 : i32, i32
  }
  func.func @transform_14(%arg0: i32) -> (i32, i32) {
    %c0_i32 = arith.constant 0 : i32
    %c0_i32_0 = arith.constant 0 : i32
    %c0_i32_1 = arith.constant 0 : i32
    return %c0_i32, %c0_i32_0 : i32, i32
  }
  func.func @transform_15(%arg0: i32) -> (i32, i32) {
    %c0_i32 = arith.constant 0 : i32
    %c0_i32_0 = arith.constant 0 : i32
    %c0_i32_1 = arith.constant 0 : i32
    return %c0_i32, %c0_i32_0 : i32, i32
  }
  func.func @transform_16(%arg0: i32) -> (i32, i32) {
    %c0_i32 = arith.constant 0 : i32
    %c0_i32_0 = arith.constant 0 : i32
    %c0_i32_1 = arith.constant 0 : i32
    return %c0_i32, %c0_i32_0 : i32, i32
  }
  func.func @transform_17(%arg0: i32) -> (i32, i32) {
    %c0_i32 = arith.constant 0 : i32
    %c0_i32_0 = arith.constant 0 : i32
    %c0_i32_1 = arith.constant 0 : i32
    return %c0_i32, %c0_i32_0 : i32, i32
  }
  func.func @transform_18(%arg0: i32) -> (i32, i32) {
    %c0_i32 = arith.constant 0 : i32
    %c0_i32_0 = arith.constant 0 : i32
    %c0_i32_1 = arith.constant 0 : i32
    return %c0_i32, %c0_i32_0 : i32, i32
  }
  func.func @transform_19(%arg0: i32) -> (i32, i32) {
    %c0_i32 = arith.constant 0 : i32
    %c0_i32_0 = arith.constant 0 : i32
    %c0_i32_1 = arith.constant 0 : i32
    return %c0_i32, %c0_i32_0 : i32, i32
  }
  func.func @transform_20(%arg0: i32) -> (i32, i32) {
    %c0_i32 = arith.constant 0 : i32
    %c0_i32_0 = arith.constant 0 : i32
    %c0_i32_1 = arith.constant 0 : i32
    return %c0_i32, %c0_i32_0 : i32, i32
  }
  func.func @transform_21(%arg0: i32) -> (i32, i32, i32) {
    %c0_i32 = arith.constant 0 : i32
    %c0_i32_0 = arith.constant 0 : i32
    %c0_i32_1 = arith.constant 0 : i32
    return %arg0, %c0_i32, %c0_i32_0 : i32, i32, i32
  }
}

</mosaic_0001>

<bundles_post_ra>
// kernel: segment_head_forward.1
= control target key start
LH: loop header
LB: loop body
LE: loop exit
PB: predicated region body
PF: predicated region fallthrough
CT: control target
= control target key end

     0   :  { %s3173_s0 = inlined_call_operand.vmem [shape: f32[2,8,64], index: 0, kind: input, shape index: {}]   ;;  %s3174_s1 = inlined_call_operand.vmem [shape: f32[2,3,96], index: 1, kind: input, shape index: {}]   ;;  %s3175_s2 = inlined_call_operand.vmem [shape: bf16[2,8], index: 2, kind: input, shape index: {}]   ;;  %s3176_s3 = inlined_call_operand.vmem [shape: f32[2,1], index: 3, kind: input, shape index: {}]   ;;  %s3177_s4 = inlined_call_operand.vmem [shape: bf16[4,6], index: 4, kind: input, shape index: {}]   ;;  %s3178_s5 = inlined_call_operand.vmem [shape: f32[4,1], index: 5, kind: input, shape index: {}]   ;;  %s3179_s6 = inlined_call_operand.vmem [shape: bf16[64,128], index: 6, kind: input, shape index: {}]   ;;  %s3180_s7 = inlined_call_operand.vmem [shape: bf16[64,128], index: 7, kind: input, shape index: {}]   ;;  %s3181_s8 = inlined_call_operand.vmem [shape: bf16[32,18], index: 8, kind: input, shape index: {}]   ;;  %s3182_s9 = inlined_call_operand.vmem [shape: f32[32,1], index: 9, kind: input, shape index: {}]   ;;  %s3183_s10 = inlined_call_operand.vmem [shape: bf16[2,32], index: 10, kind: input, shape index: {}]   ;;  %s3184_s11 = inlined_call_operand.vmem [shape: f32[2,1], index: 11, kind: input, shape index: {}]   ;;  %s3185_s12 = inlined_call_operand.vmem [shape: bf16[32,18], index: 12, kind: input, shape index: {}]   ;;  %s3186_s13 = inlined_call_operand.vmem [shape: f32[32,1], index: 13, kind: input, shape index: {}]   ;;  %s3187_s14 = inlined_call_operand.vmem [shape: bf16[4,32], index: 14, kind: input, shape index: {}]   ;;  %s3188_s15 = inlined_call_operand.vmem [shape: f32[4,1], index: 15, kind: input, shape index: {}]   ;;  %s3189_s16 = inlined_call_operand.vmem [shape: f32[128,96], index: 16, kind: input, shape index: {}]   ;;  %s3190_s17 = inlined_call_operand.vmem [shape: f32[4,4], index: 17, kind: input, shape index: {}]   ;;  %s3191_s18 = inlined_call_operand.vmem [shape: f32[2,64], index: 18, kind: input, shape index: {}]   ;;  %s3192_s19 = inlined_call_operand.vmem [shape: f32[9,128], index: 19, kind: input, shape index: {}]   ;;  %s3193_s20 = inlined_call_operand.vmem [shape: f32[8,96], index: 20, kind: input, shape index: {}]   ;;  %s3194_s21 = inlined_call_operand.vmem [shape: f32[2,4,96], index: 21, kind: output, shape index: {}]  }
   0x1   :  { %3200 = sst [smem:[#allocation2_spill]] %s3173_s0 }
   0x2   :  { %3201 = sst [smem:[#allocation3_spill]] %s3174_s1 }
   0x3   :  { %3202 = sst [smem:[#allocation4_spill]] %s3175_s2  ;;  %s2653_s2 = smov 0  }
   0x4   :  { %3203 = sst [smem:[#allocation5_spill]] %s3176_s3 }
   0x5   :  { %3204 = sst [smem:[#allocation6_spill]] %s3177_s4 }
   0x6   :  { %3205 = sst [smem:[#allocation7_spill]] %s3178_s5 }
   0x7 LB: > { %s2231_s25 = sadd.s32 4294967295, %s2519_s2   ;;  %p2235_p0 = scmp.ge.s32.totalorder %s2519_s2, 1  ;;  %s2519_s2 = sphi %s2653_s2, %s31_s2  }
   0x8   : > { %p595_p1 = scmp.lt.s32.totalorder %s2519_s2, 3 }
   0xa   : > { %p596_p2 = pnand %p2235_p0, %p595_p1 }
   0xb   : > { %p657_p3 = scmp.lt.s32.totalorder (!%p596_p2), %s2231_s25, 1  ;;  %s3206_s3 = sld [smem:[#allocation5_spill]] (!%p596_p2) }
   0xc   : > { %599 = sbr.rel (%p596_p2) target bundleno = 4151 (0x1037), region = 104  ;;  %s3207_s4 = sld [smem:[#allocation2_spill]] (!%p596_p2) }
   0xd   : > { %s3208_s23 = sld [smem:[#allocation4_spill]] (!%p596_p2)  ;;  %s2524_s26 = smov (!%p596_p2), 64  }
   0xe   : > { %s3198_s27 = smov (!%p596_p2), 1   ;;  %s2527_s0 = smov (!%p596_p2), 127  }
   0xf   : > { %s3209_s1 = sld [smem:[#allocation7_spill]] (!%p596_p2)  ;;  %s2529_s29 = smov (!%p596_p2), 16  }
  0x10   : > { %s3199_s24 = smov (!%p596_p2), 112   ;;  %s3211_s5 = smov (!%p596_p2), 15  }
  0x11   : > { %v2521_v0 = vmov 0.0   ;;  %vm2522_vm0 = vmmov 0   ;;  %v673_v1 = vld [vmem:[%s3206_s3] sm:$0x3]  ;;  %s3218_s25 = smov (!%p657_p3, %s2231_s25), 1  ;;  %v2523_v2 = vmov 0   ;;  %v736_v7 = vlaneseq }
  0x12   : > { %2321 = vmatprep.subr.bf16.mxu0 %v2521_v0  ;;  %2323 = vmatprep.mubr.msk.bf16.mxu0 %vm2522_vm0, %v2521_v0  ;;  %s2236_s28 = sshll.u32 %s3218_s25, 3  ;;  %vm683_vm1 = vcmask 1043456   ;;  %vm679_vm2 = vcmask 64512   ;;  %v728_v14 = vld [vmem:[%s3191_s18] sm:$0x3]  ;;  %vm729_vm3 = vcmask 1048064  }
  0x13   : > { %2471 = vset.pattern.permute.xlu0 %v2523_v2  ;;  %2327 = vmatprep.subr.bf16.mxu1 %v2521_v0  ;;  %s660_s30 = scalar_lea.vmem %s3207_s4, %s2236_s28  ;;  %v670_v5 = vld [vmem:[%s3208_s23] sm:$0x1]  ;;  %v2683_v8 = vshrl.u32 %v736_v7, 7  ;;  %s2526_s3 = smov 63   ;;  %v2474_v30 = vld [vmem:[%s3180_s7 + $0x18] sm:$0xff]   ;;  %v2476_v32 = vld [vmem:[%s3180_s7 + $0x10] sm:$0xff]  }
  0x14   : > { %676 = vperm.xlu0 %2471, %v673_v1   ;;  %2329 = vmatprep.mubr.msk.bf16.mxu1 %vm2522_vm0, %v2521_v0  ;;  %v671_v3 = vld [vmem:[%s660_s30] sm:$0xff]  ;;  %s2528_s4 = smov 65   ;;  %vm765_vm4 = vcmask 1041408   ;;  %vm779_vm5 = vcmask 1042432   ;;  %vm775_vm6 = vcmask 48128   ;;  %v2473_v41 = vld [vmem:[%s3179_s6 + $0x18] sm:$0xff]  }
  0x15   : > { %2472 = vset.pattern.permute.xlu1 %v2523_v2  ;;  %v672_v4 = vpack.c.bf16 %v671_v3, %v671_v3  ;;  %v2686_v12 = vsub.s32 1, %v2683_v8  ;;  %v2694_v19 = vsub.s32 0, %v2683_v8  ;;  %v769_v33 = vld [vmem:[%s3209_s1] sm:$0xf]  ;;  %v2475_v42 = vld [vmem:[%s3179_s6 + $0x10] sm:$0xff]   ;;  %v2477_v43 = vld [vmem:[%s3179_s6 + $0x8] sm:$0xff]  }
  0x16   : > { %v2478_v44 = vld [vmem:[%s3180_s7 + $0x8] sm:$0xff]   ;;  %v2479_v45 = vld [vmem:[%s3179_s6] sm:$0xff]   ;;  %vm867_vm7 = vcmask 523264   ;;  %s3197_s30 = smov 15   ;;  %vm1101_vm8 = vcmask 146432   ;;  %s3196_s23 = smov 17  }
  0x17   : > { %v685_v6 = vsel %vm683_vm1, %v672_v4, 0  ;;  %v748_v17 = vrot.slane %v728_v14, %v2686_v12  ;;  %v739_v22 = vrot.slane %v728_v14, %v2694_v19  ;;  %v2480_v46 = vld [vmem:[%s3180_s7] sm:$0xff]   ;;  %s3195_s1 = smov 111   ;;  %v1070_v3 = vld [vmem:[%s3182_s9 + $0x18] sm:$0xff]  ;;  %v1069_v4 = vld [vmem:[%s3182_s9 + $0x10] sm:$0xff]  ;;  %v1019_v14 = vsub.s32 6, %v2683_v8 }
  0x18   : > { %2322 = vmatpush3.bf16.msra.mxu0 %v685_v6  ;;  %v2481_v2 = vld [vmem:[%s3181_s8] sm:$0xff]   ;;  %vm1108_vm9 = vcmask 1040384   ;;  %vm1056_vm10 = vcmask 1045504   ;;  %vm1174_vm11 = vcmask 261120   ;;  %s2237_s22 = sshll.u32 %s3218_s25, 2  ;;  %vm1509_vm12 = vcmask 1048320  }
  0x19   : > { %2333 = vmatprep.subr.bf16.mxu0 %v2521_v0  ;;  %v1067_v6 = vld [vmem:[%s3182_s9] sm:$0xff]  ;;  %vm1672_vm13 = vcmask 781312   ;;  %s2536_s28 = smov 45   ;;  %vm1544_vm14 = vcmask 359424   ;;  %vm1522_vm15 = vcmask 367616  }
  0x1a   : > { %v1168_v7 = vld [vmem:[%s3184_s11] sm:$0x3] }
  0x1b   : > { %2324 = vmatmul.mubr.msk.bf16.vlgmr.msra.gmra.mxu0 %vm679_vm2, %v670_v5  ;;  %v1068_v5 = vld [vmem:[%s3182_s9 + $0x8] sm:$0xff]  ;;  %vm1565_vm2 = vcmask 351232  }
  0x1c   : > { %2341 = vmatprep.mubr.msk.bf16.mxu0 %vm2522_vm0, %v2521_v0  ;;  %2334 = vmatpush3.bf16.msra.mxu0 %v2474_v30 }
  0x1d   : > { %2335 = vmatprep.subr.bf16.mxu0 %v2521_v0 }
  0x20   : > { %2336 = vmatpush3.bf16.msra.mxu0 %v2476_v32 }
  0x21   : > { %2337 = vmatprep.subr.bf16.mxu0 %v2521_v0 }
  0x24   : > { %2338 = vmatpush3.bf16.msra.mxu0 %v2478_v44 }
  0x25   : > { %2339 = vmatprep.subr.bf16.mxu0 %v2521_v0 }
  0x28   : > { %2340 = vmatpush3.bf16.msra.mxu0 %v2480_v46 }
  0x8f   : > { %v677_v9 = vpop.permute.xlu0 %676 }
  0xdb   : > { %v721_v10 = vpop.f32.mrf.mxu0 }
  0xdc   : > { %v722_v11 = vadd.f32 %v721_v10, %v677_v9  ;;  %v1012_v9 = vsub.s32 5, %v2683_v8  ;;  %v978_v10 = vld [vmem:[%s3192_s19] sm:$0xff] }
  0xdd   : > { %v2325_v13 = vpop.f32.mrf.mxu0 }
  0xde   : > { %v727_v15 = vmax.f32 %v722_v11, 0.0 }
  0xdf   : > { %v724_v16 = vpop.f32.mrf.mxu0 }
  0xe0   : > { %730 = vrot.lane.b32.xlu0 %v727_v15, %s2524_s26  ;;  %v2784_v16 = vrot.slane %v978_v10, %v1012_v9 }
  0xe1   : > { %v2326_v18 = vpop.f32.mrf.mxu0 }
  0xe2   : > { %v2791_v18 = vrot.slane %v978_v10, %v1019_v14 }
  0xe4   : > { %750 = vrot.lane.b32.xlu0 %v748_v17, %s3198_s27  ;;  %v2787_v17 = vrot.slane %v978_v10, %v2686_v12 }
 0x152   : > { %v731_v20 = vpop.permute.xlu0 %730 }
 0x153   : > { %v732_v21 = vsel %vm729_vm3, %v731_v20, %v727_v15 }
 0x154   : > { %733 = vrot.lane.b32.xlu1 %v732_v21, %s2524_s26  ;;  %s2538_s26 = smov 43  }
 0x156   : > { %v751_v23 = vpop.permute.xlu0 %750 }
 0x158   : > { %741 = vrot.lane.b32.xlu1 %v739_v22, %s2526_s3  ;;  %s3210_s3 = sld [smem:[#allocation6_spill]]  ;;  %v2794_v22 = vrot.slane %v978_v10, %v2694_v19 }
 0x15e   : > { %v754_v40 = vld [vmem:[%s3210_s3] sm:$0x3]  ;;  %s3212_s3 = smov 17  }
 0x1c6   : > { %v734_v24 = vpop.permute.xlu1 %733 }
 0x1c7   : > { %v735_v25 = vsel %vm729_vm3, %v734_v24, %v727_v15  ;;  %v1005_v24 = vsub.s32 3, %v2683_v8  ;;  %vm1586_vm3 = vcmask 269312  }
 0x1c8   : > { %v753_v26 = vmul.f32 %v751_v23, %v735_v25  ;;  %v1026_v23 = vsub.s32 7, %v2683_v8 }
 0x1ca   : > { %v761_v27 = vrot.slane %v753_v26, 4  ;;  %v742_v28 = vpop.permute.xlu1 %741  ;;  %v2805_v26 = vld [vmem:[%s3192_s19 + $0x8] ss:$0 sm:$0xff] }
 0x1cb   : > { %v744_v29 = vmul.f32 %v742_v28, %v735_v25 }
 0x1cc   : > { %762 = vrot.lane.b32.xlu0 %v761_v27, %s2527_s0 }
 0x1cd   : > { %v756_v31 = vrot.slane %v744_v29, 6 }
 0x1cf   : > { %757 = vrot.lane.b32.xlu1 %v756_v31, %s2528_s4  ;;  %s2530_s4 = smov 113  }
 0x1d3   : > { %772 = vperm.xlu1 %2472, %v769_v33  }
 0x23e   : > { %v763_v35 = vpop.permute.xlu0 %762 }
 0x241   : > { %v758_v34 = vpop.permute.xlu1 %757 }
 0x242   : > { %v766_v36 = vsel %vm765_vm4, %v727_v15, %v758_v34  ;;  %v998_v15 = vsub.s32 2, %v2683_v8  ;;  %v2814_v34 = vrot.slane %v978_v10, %v1026_v23 }
 0x243   : > { %v767_v37 = vsel %vm683_vm1, %v766_v36, %v763_v35  ;;  %v2818_v35 = vrot.slane %v978_v10, %v1005_v24 }
 0x244   : > { %v768_v38 = vpack.c.bf16 %v767_v37, %v767_v37  ;;  %v2800_v25 = vrot.slane %v978_v10, %v998_v15 }
 0x246   : > { %v781_v39 = vsel %vm779_vm5, %v768_v38, 0  ;;  %vm1783_vm5 = vcmask 31744  }
 0x247   : > { %2328 = vmatpush3.bf16.msra.mxu1 %v781_v39 }
 0x248   : > { %2345 = vmatprep.subr.bf16.mxu1 %v2521_v0 }
 0x24a   : > { %2330 = vmatmul.mubr.msk.bf16.vlgmr.msra.gmra.mxu1 %vm775_vm6, %v754_v40 }
 0x24b   : > { %2346 = vmatpush3.bf16.msra.mxu1 %v2473_v41  ;;  %2353 = vmatprep.mubr.msk.bf16.mxu1 %vm2522_vm0, %v2521_v0 }
 0x24c   : > { %2347 = vmatprep.subr.bf16.mxu1 %v2521_v0 }
 0x24e   : > { %v773_v47 = vpop.permute.xlu1 %772 }
 0x24f   : > { %2348 = vmatpush3.bf16.msra.mxu1 %v2475_v42 }
 0x250   : > { %2349 = vmatprep.subr.bf16.mxu1 %v2521_v0 }
 0x253   : > { %2350 = vmatpush3.bf16.msra.mxu1 %v2477_v43 }
 0x254   : > { %2351 = vmatprep.subr.bf16.mxu1 %v2521_v0 }
 0x257   : > { %2352 = vmatpush3.bf16.msra.mxu1 %v2479_v45 }
 0x30a   : > { %v817_v48 = vpop.f32.mrf.mxu1 }
 0x30b   : > { %v818_v49 = vadd.f32 %v817_v48, %v773_v47 }
 0x30c   : > { %v2331_v50 = vpop.f32.mrf.mxu1 }
 0x30d   : > { %v823_v51 = vmax.f32 %v818_v49, 0.0 }
 0x30e   : > { %v820_v52 = vpop.f32.mrf.mxu1 }
 0x30f   : > { %v832_v53 = vpack.c.bf16 %v823_v51, %v823_v51 }
 0x310   : > { %v2332_v54 = vpop.f32.mrf.mxu1 }
 0x311   : > { %v842_v55 = vrot.slane %v832_v53, 1  ;;  %2354 = vmatmul.mubr.msk.bf16.vlgmr.msra.gmra.mxu1 %vm867_vm7, %v832_v53 }
 0x312   : > { %2361 = vmatprep.mubr.msk.bf16.mxu1 %vm1101_vm8, %v2481_v2 }
 0x313   : > { %2342 = vmatmul.mubr.msk.bf16.vlgmr.msra.gmra.mxu0 %vm867_vm7, %v842_v55 }
 0x3d1   : > { %v972_v56 = vpop.f32.mrf.mxu1 }
 0x3d3   : > { %v905_v57 = vpop.f32.mrf.mxu0  ;;  %v2355_v58 = vpop.f32.mrf.mxu1 }
 0x3d4   : > { %v2739_v59 = vadd.f32 %v972_v56, %v905_v57  ;;  %v2482_v56 = vld [vmem:[%s3181_s8 + $0x8] sm:$0xff]  }
 0x3d5   : > { %v2343_v60 = vpop.f32.mrf.mxu0  ;;  %v975_v61 = vpop.f32.mrf.mxu1 }
 0x3d6   : > { %1008 = vrot.lane.b32.xlu1 %v2739_v59, %s2527_s0  ;;  %987 = vrot.lane.b32.xlu0 %v2739_v59, %s2529_s29 }
 0x3d7   : > { %v908_v62 = vpop.f32.mrf.mxu0  ;;  %v2356_v63 = vpop.f32.mrf.mxu1 }
 0x3d9   : > { %v2344_v1 = vpop.f32.mrf.mxu0 }
 0x3da   : > { %1015 = vrot.lane.b32.xlu1 %v2739_v59, %s2530_s4  ;;  %994 = vrot.lane.b32.xlu0 %v2739_v59, %s3197_s30  ;;  %s3214_s30 = smov 112  }
 0x3de   : > { %980 = vrot.lane.b32.xlu1 %v2739_v59, %s3196_s23  ;;  %1029 = vrot.lane.b32.xlu0 %v2739_v59, %s3195_s1  ;;  %s3215_s23 = smov 1  }
 0x3e2   : > { %1022 = vrot.lane.b32.xlu1 %v2739_v59, %s3199_s24  ;;  %1001 = vrot.lane.b32.xlu0 %v2739_v59, %s3198_s27  ;;  %s3213_s27 = smov 111   ;;  %s2535_s24 = smov 96  }
 0x3e6   : > { %1088 = vperm.xlu1 %2472, %v1070_v3   ;;  %1083 = vperm.xlu0 %2471, %v1069_v4  }
 0x3ea   : > { %1078 = vperm.xlu1 %2472, %v1068_v5   ;;  %1073 = vperm.xlu0 %2471, %v1067_v6  }
 0x3ee   : > { %1171 = vperm.xlu0 %2471, %v1168_v7  }
 0x448   : > { %v1009_v11 = vpop.permute.xlu1 %1008  ;;  %v988_v13 = vpop.permute.xlu0 %987 }
 0x449   : > { %v1014_v27 = vmul.f32 %v2784_v16, %v1009_v11  ;;  %v993_v28 = vmul.f32 %v2787_v17, %v988_v13 }
 0x44b   : > { %v1046_v37 = vrot.slane %v1014_v27, 6  ;;  %v1037_v38 = vrot.slane %v993_v28, 6 }
 0x44c   : > { %v1016_v20 = vpop.permute.xlu1 %1015  ;;  %v995_v21 = vpop.permute.xlu0 %994 }
 0x44d   : > { %v1021_v29 = vmul.f32 %v2791_v18, %v1016_v20  ;;  %v1000_v36 = vmul.f32 %v2800_v25, %v995_v21  ;;  %v1058_v48 = vsel %vm765_vm4, %v2739_v59, %v1046_v37  ;;  %v1165_v21 = vld [vmem:[%s3183_s10] sm:$0x1]  ;;  %v1276_v37 = vld [vmem:[%s3186_s13 + $0x18] sm:$0xff] }
 0x44f   : > { %v1049_v40 = vrot.slane %v1021_v29, 4  ;;  %v1040_v47 = vrot.slane %v1000_v36, 4  ;;  %v2483_v36 = vld [vmem:[%s3185_s12] sm:$0xff]  }
 0x450   : > { %v981_v30 = vpop.permute.xlu1 %980  ;;  %v1030_v31 = vpop.permute.xlu0 %1029  ;;  %2377 = vmatprep.mubr.msk.bf16.mxu0 %vm1101_vm8, %v2483_v36 }
 0x451   : > { %v986_v32 = vmul.f32 %v2794_v22, %v981_v30  ;;  %v1035_v33 = vmul.f32 %v2805_v26, %v1030_v31  ;;  %v1059_v51 = vsel %vm683_vm1, %v1058_v48, %v1049_v40  ;;  %v1273_v40 = vld [vmem:[%s3186_s13] sm:$0xff] }
 0x453   : > { %v1066_v39 = vpack.c.bf16 %v1035_v33, %v1035_v33  ;;  %v1054_v43 = vsel %vm765_vm4, %v986_v32, %v1037_v38  ;;  %v1275_v38 = vld [vmem:[%s3186_s13 + $0x10] sm:$0xff] }
 0x454   : > { %v1023_v41 = vpop.permute.xlu1 %1022  ;;  %v1002_v42 = vpop.permute.xlu0 %1001  ;;  %v1055_v52 = vsel %vm683_vm1, %v1054_v43, %v1040_v47 }
 0x455   : > { %v1110_v44 = vsel %vm1108_vm9, %v1066_v39, 0  ;;  %v1028_v45 = vmul.f32 %v2814_v34, %v1023_v41  ;;  %v1007_v46 = vmul.f32 %v2818_v35, %v1002_v42  ;;  %2439 = vmatprep.subr.msk.bf16.mxu1 %vm1108_vm9, %v1066_v39  ;;  %v1274_v39 = vld [vmem:[%s3186_s13 + $0x8] sm:$0xff]  ;;  %v1372_v41 = vld [vmem:[%s3188_s15] sm:$0xf] }
 0x456   : > { %2358 = vmatpush3.bf16.msra.mxu1 %v1110_v44 }
 0x457   : > { %v1052_v49 = vrot.slane %v1028_v45, 2  ;;  %v1043_v50 = vrot.slane %v1007_v46, 2 }
 0x459   : > { %v1057_v53 = vsel %vm1056_vm10, %v1055_v52, %v1043_v50  ;;  %v1060_v54 = vsel %vm1056_vm10, %v1059_v51, %v1052_v49 }
 0x45a   : > { %v1065_v55 = vpack.c.bf16 %v1060_v54, %v1057_v53 }
 0x45c   : > { %2359 = vmatprep.subr.bf16.mxu1 %v1065_v55 }
 0x45d   : > { %2360 = vmatpush3.bf16.msra.mxu1 %v1065_v55 }
 0x45e   : > { %2365 = vmatprep.subr.bf16.mxu1 %v2521_v0 }
 0x460   : > { %2362 = vmatmul.mubr.msk.bf16.vlgmr.msra.gmra.mxu1 %vm1101_vm8, %v2482_v56 }
 0x461   : > { %2369 = vmatprep.mubr.msk.bf16.mxu1 %vm2522_vm0, %v2521_v0  ;;  %v1089_v57 = vpop.permute.xlu1 %1088  ;;  %v1084_v58 = vpop.permute.xlu0 %1083 }
 0x465   : > { %v1079_v63 = vpop.permute.xlu1 %1078  ;;  %v1074_v2 = vpop.permute.xlu0 %1073 }
 0x469   : > { %v1172_v27 = vpop.permute.xlu0 %1171 }
 0x520   : > { %v2363_v59 = vpop.f32.mrf.mxu1 }
 0x521   : > { %v1155_v61 = vadd.f32 %v2363_v59, %v1084_v58 }
 0x522   : > { %v1146_v60 = vpop.f32.mrf.mxu1 }
 0x523   : > { %v1163_v4 = vmax.f32 %v1155_v61, 0.0  ;;  %v1147_v5 = vadd.f32 %v1146_v60, %v1074_v2 }
 0x524   : > { %v2364_v62 = vpop.f32.mrf.mxu1 }
 0x525   : > { %v1158_v1 = vadd.f32 %v2364_v62, %v1089_v57  ;;  %v1161_v13 = vmax.f32 %v1147_v5, 0.0  ;;  %v1434_v5 = vld [vmem:[%s3189_s16 + $0x68] sm:$0xff] }
 0x526   : > { %v1149_v3 = vpop.f32.mrf.mxu1 }
 0x527   : > { %v1164_v6 = vmax.f32 %v1158_v1, 0.0  ;;  %v1150_v7 = vadd.f32 %v1149_v3, %v1079_v63 }
 0x529   : > { %v1167_v10 = vpack.c.bf16 %v1164_v6, %v1163_v4  ;;  %v1162_v11 = vmax.f32 %v1150_v7, 0.0  ;;  %v1435_v4 = vld [vmem:[%s3189_s16 + $0x70] sm:$0xff]  ;;  %v1433_v6 = vld [vmem:[%s3189_s16 + $0x60] sm:$0xff]  ;;  %v1432_v7 = vld [vmem:[%s3189_s16 + $0x58] sm:$0xff] }
 0x52b   : > { %2366 = vmatpush3.bf16.msra.mxu1 %v1167_v10  ;;  %v1166_v20 = vpack.c.bf16 %v1162_v11, %v1161_v13  ;;  %v1431_v10 = vld [vmem:[%s3189_s16 + $0x50] sm:$0xff]  ;;  %v1430_v11 = vld [vmem:[%s3189_s16 + $0x48] sm:$0xff]  ;;  %v1429_v13 = vld [vmem:[%s3189_s16 + $0x40] sm:$0xff] }
 0x52c   : > { %2367 = vmatprep.subr.bf16.mxu1 %v2521_v0 }
 0x52f   : > { %2368 = vmatpush3.bf16.msra.mxu1 %v1166_v20  ;;  %v1428_v20 = vld [vmem:[%s3189_s16 + $0x38] sm:$0xff] }
 0x530   : > { %2381 = vmatprep.subr.bf16.mxu1 %v2521_v0 }
 0x532   : > { %2370 = vmatmul.mubr.msk.bf16.vlgmr.msra.gmra.mxu1 %vm1174_vm11, %v1165_v21  ;;  %v1427_v21 = vld [vmem:[%s3189_s16 + $0x30] sm:$0xff] }
 0x533   : > { %2385 = vmatprep.mubr.msk.bf16.mxu1 %vm2522_vm0, %v2521_v0 }
 0x5f2   : > { %v1212_v28 = vpop.f32.mrf.mxu1 }
 0x5f3   : > { %v1213_v29 = vadd.f32 %v1212_v28, %v1172_v27  ;;  %v1426_v27 = vld [vmem:[%s3189_s16 + $0x28] sm:$0xff]  ;;  %v1425_v28 = vld [vmem:[%s3189_s16 + $0x20] sm:$0xff] }
 0x5f4   : > { %v2371_v30 = vpop.f32.mrf.mxu1 }
 0x5f5   : > { %v1218_v31 = vmax.f32 %v1213_v29, 0.0  ;;  %v1424_v29 = vld [vmem:[%s3189_s16 + $0x18] sm:$0xff]  ;;  %v1423_v30 = vld [vmem:[%s3189_s16 + $0x10] sm:$0xff] }
 0x5f6   : > { %v1215_v32 = vpop.f32.mrf.mxu1 }
 0x5f7   : > { %1231 = vrot.lane.b32.xlu0 %v1218_v31, %s2527_s0  ;;  %1222 = vrot.lane.b32.xlu1 %v1218_v31, %s2529_s29 }
 0x5f8   : > { %v2372_v33 = vpop.f32.mrf.mxu1 }
 0x5fb   : > { %1234 = vrot.lane.b32.xlu0 %v1218_v31, %s2530_s4  ;;  %1225 = vrot.lane.b32.xlu1 %v1218_v31, %s3211_s5  ;;  %s2537_s5 = smov 44  }
 0x5ff   : > { %1219 = vrot.lane.b32.xlu0 %v1218_v31, %s3212_s3  ;;  %1240 = vrot.lane.b32.xlu1 %v1218_v31, %s3213_s27  ;;  %s2539_s3 = smov 33   ;;  %s2540_s27 = smov 116  }
 0x603   : > { %1237 = vrot.lane.b32.xlu0 %v1218_v31, %s3214_s30  ;;  %1228 = vrot.lane.b32.xlu1 %v1218_v31, %s3215_s23  ;;  %s3216_s23 = sld [smem:[#allocation3_spill]]  ;;  %s2541_s30 = smov 117  }
 0x607   : > { %1294 = vperm.xlu0 %2471, %v1276_v37   ;;  %1289 = vperm.xlu1 %2472, %v1275_v38  }
 0x609   : > { %s664_s29 = scalar_lea.vmem %s3216_s23, %s2237_s22  ;;  %s2542_s23 = smov 115  }
 0x60b   : > { %1284 = vperm.xlu0 %2471, %v1274_v39   ;;  %1279 = vperm.xlu1 %2472, %v1273_v40  }
 0x60f   : > { %1375 = vperm.xlu1 %2472, %v1372_v41  }
 0x669   : > { %v1232_v42 = vpop.permute.xlu0 %1231  ;;  %v1223_v43 = vpop.permute.xlu1 %1222 }
 0x66a   : > { %v1233_v46 = vmul.f32 %v1232_v42, %v2784_v16  ;;  %v1224_v47 = vmul.f32 %v1223_v43, %v2787_v17 }
 0x66c   : > { %v1253_v54 = vrot.slane %v1233_v46, 6  ;;  %v1244_v55 = vrot.slane %v1224_v47, 6 }
 0x66d   : > { %v1235_v44 = vpop.permute.xlu0 %1234  ;;  %v1226_v45 = vpop.permute.xlu1 %1225 }
 0x66e   : > { %v1236_v48 = vmul.f32 %v1235_v44, %v2791_v18  ;;  %v1227_v53 = vmul.f32 %v1226_v45, %v2800_v25  ;;  %v1264_v25 = vsel %vm765_vm4, %v1218_v31, %v1253_v54  ;;  %v2974_v54 = vld [vmem:[%s664_s29] sm:$0x7] }
 0x66f   : > { %1510 = vrot.lane.b32.xlu0 %v2974_v54, %s2535_s24 }
 0x670   : > { %v1256_v57 = vrot.slane %v1236_v48, 4 }
 0x671   : > { %v1220_v49 = vpop.permute.xlu0 %1219  ;;  %v1241_v50 = vpop.permute.xlu1 %1240 }
 0x672   : > { %v1221_v51 = vmul.f32 %v1220_v49, %v2794_v22  ;;  %v1242_v52 = vmul.f32 %v2805_v26, %v1241_v50  ;;  %v1247_v22 = vrot.slane %v1227_v53, 4  ;;  %v1265_v62 = vsel %vm683_vm1, %v1264_v25, %v1256_v57  ;;  %v1421_v53 = vld [vmem:[%s3189_s16] sm:$0xff] }
 0x674   : > { %v1272_v56 = vpack.c.bf16 %v1242_v52, %v1242_v52  ;;  %v1261_v16 = vsel %vm765_vm4, %v1221_v51, %v1244_v55  ;;  %v1369_v51 = vld [vmem:[%s3187_s14] sm:$0x3]  ;;  %v1422_v52 = vld [vmem:[%s3189_s16 + $0x8] sm:$0xff]  ;;  %vm1527_vm4 = vcmask 780288  }
 0x675   : > { %v1238_v58 = vpop.permute.xlu0 %1237  ;;  %v1229_v59 = vpop.permute.xlu1 %1228  ;;  %v1262_v63 = vsel %vm683_vm1, %v1261_v16, %v1247_v22 }
 0x676   : > { %v1314_v17 = vsel %vm1108_vm9, %v1272_v56, 0  ;;  %v1239_v18 = vmul.f32 %v1238_v58, %v2814_v34  ;;  %v1230_v60 = vmul.f32 %v1229_v59, %v2818_v35  ;;  %2440 = vmatprep.subr.msk.bf16.mxu0 %vm1108_vm9, %v1272_v56  ;;  %v2484_v34 = vld [vmem:[%s3185_s12 + $0x8] sm:$0xff]   ;;  %v1436_v35 = vld [vmem:[%s3189_s16 + $0x78] sm:$0xff] }
 0x677   : > { %2374 = vmatpush3.bf16.msra.mxu0 %v1314_v17 }
 0x678   : > { %v1259_v26 = vrot.slane %v1239_v18, 2  ;;  %v1250_v61 = vrot.slane %v1230_v60, 2 }
 0x67a   : > { %v1263_v1 = vsel %vm1056_vm10, %v1262_v63, %v1250_v61  ;;  %v1266_v2 = vsel %vm1056_vm10, %v1265_v62, %v1259_v26 }
 0x67b   : > { %v1271_v3 = vpack.c.bf16 %v1266_v2, %v1263_v1 }
 0x67d   : > { %2375 = vmatprep.subr.bf16.mxu0 %v1271_v3 }
 0x67e   : > { %2376 = vmatpush3.bf16.msra.mxu0 %v1271_v3 }
 0x67f   : > { %2389 = vmatprep.subr.mxu0 %v2521_v0 }
 0x681   : > { %2378 = vmatmul.mubr.msk.bf16.vlgmr.msra.gmra.mxu0 %vm1101_vm8, %v2484_v34 }
 0x682   : > { %2421 = vmatprep.mubr.msk.f32.mxu0 %vm2522_vm0, %v2521_v0  ;;  %2390 = vmatpush3.msra.mxu0 %v1436_v35  ;;  %v1295_v31 = vpop.permute.xlu0 %1294  ;;  %v1290_v32 = vpop.permute.xlu1 %1289 }
 0x683   : > { %2391 = vmatprep.subr.mxu0 %v2521_v0 }
 0x684   : > { %2392 = vmatpush3.msra.mxu0 %v1435_v4 }
 0x685   : > { %2393 = vmatprep.subr.mxu0 %v2521_v0 }
 0x686   : > { %2394 = vmatpush3.msra.mxu0 %v1434_v5  ;;  %v1285_v39 = vpop.permute.xlu0 %1284  ;;  %v1280_v41 = vpop.permute.xlu1 %1279 }
 0x687   : > { %2395 = vmatprep.subr.mxu0 %v2521_v0 }
 0x688   : > { %2396 = vmatpush3.msra.mxu0 %v1433_v6 }
 0x689   : > { %2397 = vmatprep.subr.mxu0 %v2521_v0 }
 0x68a   : > { %2398 = vmatpush3.msra.mxu0 %v1432_v7  ;;  %v1376_v55 = vpop.permute.xlu1 %1375 }
 0x68b   : > { %2399 = vmatprep.subr.mxu0 %v2521_v0 }
 0x68c   : > { %2400 = vmatpush3.msra.mxu0 %v1431_v10 }
 0x68d   : > { %2401 = vmatprep.subr.mxu0 %v2521_v0 }
 0x68e   : > { %2402 = vmatpush3.msra.mxu0 %v1430_v11 }
 0x68f   : > { %2403 = vmatprep.subr.mxu0 %v2521_v0 }
 0x690   : > { %2404 = vmatpush3.msra.mxu0 %v1429_v13 }
 0x691   : > { %2405 = vmatprep.subr.mxu0 %v2521_v0 }
 0x692   : > { %2406 = vmatpush3.msra.mxu0 %v1428_v20 }
 0x693   : > { %2407 = vmatprep.subr.mxu0 %v2521_v0 }
 0x694   : > { %2408 = vmatpush3.msra.mxu0 %v1427_v21 }
 0x695   : > { %2409 = vmatprep.subr.mxu0 %v2521_v0 }
 0x696   : > { %2410 = vmatpush3.msra.mxu0 %v1426_v27 }
 0x697   : > { %2411 = vmatprep.subr.mxu0 %v2521_v0 }
 0x698   : > { %2412 = vmatpush3.msra.mxu0 %v1425_v28 }
 0x699   : > { %2413 = vmatprep.subr.mxu0 %v2521_v0 }
 0x69a   : > { %2414 = vmatpush3.msra.mxu0 %v1424_v29 }
 0x69b   : > { %2415 = vmatprep.subr.mxu0 %v2521_v0 }
 0x69c   : > { %2416 = vmatpush3.msra.mxu0 %v1423_v30 }
 0x69d   : > { %2417 = vmatprep.subr.mxu0 %v2521_v0 }
 0x69e   : > { %2418 = vmatpush3.msra.mxu0 %v1422_v52 }
 0x69f   : > { %2419 = vmatprep.subr.mxu0 %v2521_v0 }
 0x6a0   : > { %2420 = vmatpush3.msra.mxu0 %v1421_v53 }
 0x6e1   : > { %v1511_v17 = vpop.permute.xlu0 %1510 }
 0x6e2   : > { %v1512_v18 = vsel %vm1509_vm12, %v1511_v17, %v2974_v54 }
 0x6e3   : > { %1513 = vrot.lane.b32.xlu0 %v1512_v18, %s2535_s24 }
 0x741   : > { %v2379_v33 = vpop.f32.mrf.mxu0 }
 0x742   : > { %v1359_v37 = vadd.f32 %v2379_v33, %v1290_v32 }
 0x743   : > { %v1350_v36 = vpop.f32.mrf.mxu0 }
 0x744   : > { %v1367_v43 = vmax.f32 %v1359_v37, 0.0  ;;  %v1351_v44 = vadd.f32 %v1350_v36, %v1280_v41 }
 0x745   : > { %v2380_v38 = vpop.f32.mrf.mxu0 }
 0x746   : > { %v1362_v40 = vadd.f32 %v2380_v38, %v1295_v31  ;;  %v1365_v49 = vmax.f32 %v1351_v44, 0.0 }
 0x747   : > { %v1353_v42 = vpop.f32.mrf.mxu0 }
 0x748   : > { %v1368_v45 = vmax.f32 %v1362_v40, 0.0  ;;  %v1354_v46 = vadd.f32 %v1353_v42, %v1285_v39 }
 0x74a   : > { %v1371_v47 = vpack.c.bf16 %v1368_v45, %v1367_v43  ;;  %v1366_v48 = vmax.f32 %v1354_v46, 0.0 }
 0x74c   : > { %2382 = vmatpush3.bf16.msra.mxu1 %v1371_v47  ;;  %v1370_v50 = vpack.c.bf16 %v1366_v48, %v1365_v49 }
 0x74d   : > { %2383 = vmatprep.subr.bf16.mxu1 %v2521_v0 }
 0x750   : > { %2384 = vmatpush3.bf16.msra.mxu1 %v1370_v50 }
 0x751   : > { %2424 = vmatprep.subr.mxu1 %v2521_v0 }
 0x753   : > { %2386 = vmatmul.mubr.msk.bf16.vlgmr.msra.gmra.mxu1 %vm1174_vm11, %v1369_v51 }
 0x754   : > { %2426 = vmatprep.mubr.msk.f32.mxu1 %vm2522_vm0, %v2521_v0 }
 0x755   : > { %v1514_v20 = vpop.permute.xlu0 %1513 }
 0x756   : > { %v1515_v21 = vsel %vm1509_vm12, %v1514_v20, %v2974_v54 }
 0x757   : > { %1518 = vrot.lane.b32.xlu0 %v1515_v21, %s2536_s28 }
 0x75b   : > { %1540 = vrot.lane.b32.xlu0 %v1515_v21, %s2537_s5 }
 0x75f   : > { %1561 = vrot.lane.b32.xlu0 %v1515_v21, %s2538_s26 }
 0x763   : > { %1582 = vrot.lane.b32.xlu0 %v1515_v21, %s2539_s3 }
 0x767   : > { %1603 = vrot.lane.b32.xlu0 %v1515_v21, %s2527_s0 }
 0x76b   : > { %1637 = vrot.lane.b32.xlu0 %v1515_v21, %s2540_s27 }
 0x7c9   : > { %v1519_v33 = vpop.permute.xlu0 %1518 }
 0x7cd   : > { %v1541_v37 = vpop.permute.xlu0 %1540 }
 0x7d1   : > { %v1562_v39 = vpop.permute.xlu0 %1561 }
 0x7d5   : > { %v1583_v43 = vpop.permute.xlu0 %1582 }
 0x7d9   : > { %v1604_v51 = vpop.permute.xlu0 %1603 }
 0x7dd   : > { %v1638_v18 = vpop.permute.xlu0 %1637 }
 0x813   : > { %v1415_v56 = vpop.f32.mrf.mxu1 }
 0x814   : > { %v1416_v57 = vadd.f32 %v1415_v56, %v1376_v55 }
 0x815   : > { %v2387_v58 = vpop.f32.mrf.mxu1 }
 0x816   : > { %2422 = vmatmul.mubr.f32.vlgmr.msra.gmra.mxu0 %v1416_v57 }
 0x817   : > { %v1418_v59 = vpop.f32.mrf.mxu1 }
 0x818   : > { %v1606_v59 = vsub.f32 %v2974_v54, %v1604_v51 }
 0x819   : > { %v2388_v16 = vpop.f32.mrf.mxu1 }
 0x8d6   : > { %v2981_v60 = vpop.f32.mrf.mxu0 }
 0x8d7   : > { %v1673_v22 = vsel %vm1672_vm13, %v2981_v60, -inf }
 0x8d8   : > { %v1674_v25 = vrot.slane %v1673_v22, 4  ;;  %v2423_v26 = vpop.f32.mrf.mxu0 }
 0x8da   : > { %v1675_v61 = vmax.f32 %v1673_v22, %v1674_v25 }
 0x8dc   : > { %v1676_v62 = vrot.slane %v1675_v61, 2 }
 0x8de   : > { %v1677_v63 = vmax.f32 %v1675_v61, %v1676_v62 }
 0x8e0   : > { %v1678_v1 = vrot.slane %v1677_v63, 1 }
 0x8e2   : > { %v1679_v2 = vmax.f32 %v1677_v63, %v1678_v1  ;;  %v1607_v63 = vmul.f32 %v1606_v59, %v1606_v59  ;;  %v1640_v1 = vsub.f32 %v2974_v54, %v1638_v18 }
 0x8e4   : > { %v1680_v3 = vsub.f32 %v2981_v60, %v1679_v2 }
 0x8e6   : > { %v1681_v34 = vmul.f32 1.442695, %v1680_v3 }
 0x8e8   : > { %2485 = vpow2.f32 %v1681_v34 }
 0x8f5   : > { %v2486_v35 = vpop.eup %2485 }
 0x8f6   : > { %v1683_v4 = vsel %vm1672_vm13, %v2486_v35, 0.0 }
 0x8f7   : > { %v1684_v5 = vrot.slane %v1683_v4, 4 }
 0x8f9   : > { %v1685_v6 = vadd.f32 %v1684_v5, %v1683_v4 }
 0x8fb   : > { %v1686_v7 = vrot.slane %v1685_v6, 2 }
 0x8fd   : > { %v1687_v10 = vadd.f32 %v1686_v7, %v1685_v6  ;;  %v1608_v7 = vsel %vm1527_vm4, %v1607_v63, 0.0 }
 0x8ff   : > { %v1688_v11 = vrot.slane %v1687_v10, 1 }
 0x901   : > { %v1689_v13 = vadd.f32 %v1688_v11, %v1687_v10  ;;  %v1641_v10 = vmul.f32 %v1640_v1, %v1640_v1 }
 0x903   : > { %2487 = vrcp.f32 %v1689_v13 }
 0x910   : > { %v2488_v27 = vpop.eup %2487 }
 0x911   : > { %v1691_v28 = vmul.f32 %v2488_v27, %v2486_v35  ;;  %v1609_v27 = vrot.slane %v1608_v7, 4 }
 0x913   : > { %1692 = vrot.lane.b32.xlu1 %v1691_v28, %s2535_s24 }
 0x985   : > { %v1693_v29 = vpop.permute.xlu1 %1692 }
 0x986   : > { %v1694_v30 = vsel %vm1509_vm12, %v1693_v29, %v1691_v28 }
 0x987   : > { %1695 = vrot.lane.b32.xlu1 %v1694_v30, %s2535_s24  ;;  %v1642_v30 = vsel %vm1527_vm4, %v1641_v10, 0.0 }
 0x98b   : > { %1520 = vrot.lane.b32.xlu1 %v1514_v20, %s2536_s28 }
 0x98f   : > { %1542 = vrot.lane.b32.xlu1 %v1514_v20, %s2537_s5 }
 0x993   : > { %1563 = vrot.lane.b32.xlu1 %v1514_v20, %s2538_s26 }
 0x997   : > { %1584 = vrot.lane.b32.xlu1 %v1514_v20, %s2539_s3 }
 0x99b   : > { %1620 = vrot.lane.b32.xlu1 %v1515_v21, %s2541_s30 }
 0x99f   : > { %1654 = vrot.lane.b32.xlu1 %v1515_v21, %s2542_s23 }
 0x9f9   : > { %v1696_v31 = vpop.permute.xlu1 %1695 }
 0x9fa   : > { %v1697_v32 = vsel %vm1509_vm12, %v1696_v31, %v1691_v28  ;;  %1706 = vrot.lane.b32.xlu1 %v1696_v31, %s2536_s28 }
 0x9fb   : > { %1704 = vrot.lane.b32.xlu0 %v1697_v32, %s2536_s28 }
 0x9fd   : > { %v1521_v36 = vpop.permute.xlu1 %1520 }
 0x9fe   : > { %1717 = vrot.lane.b32.xlu1 %v1696_v31, %s2537_s5  ;;  %v1523_v42 = vsel %vm1522_vm15, %v1519_v33, %v1521_v36  ;;  %v1610_v36 = vadd.f32 %v1609_v27, %v1608_v7 }
 0x9ff   : > { %1715 = vrot.lane.b32.xlu0 %v1697_v32, %s2537_s5  ;;  %v1525_v47 = vsub.f32 %v2974_v54, %v1523_v42 }
 0xa01   : > { %v1543_v38 = vpop.permute.xlu1 %1542  ;;  %v1526_v52 = vmul.f32 %v1525_v47, %v1525_v47 }
 0xa02   : > { %1729 = vrot.lane.b32.xlu1 %v1696_v31, %s2538_s26  ;;  %v1545_v41 = vsel %vm1544_vm14, %v1541_v37, %v1543_v38  ;;  %v1643_v37 = vrot.slane %v1642_v30, 4 }
 0xa03   : > { %1727 = vrot.lane.b32.xlu0 %v1697_v32, %s2538_s26  ;;  %v1547_v45 = vsub.f32 %v2974_v54, %v1545_v41  ;;  %v1528_v58 = vsel %vm1527_vm4, %v1526_v52, 0.0 }
 0xa04   : > { %v1529_v26 = vrot.slane %v1528_v58, 4 }
 0xa05   : > { %v1564_v40 = vpop.permute.xlu1 %1563  ;;  %v1548_v50 = vmul.f32 %v1547_v45, %v1547_v45  ;;  %v1644_v45 = vadd.f32 %v1643_v37, %v1642_v30 }
 0xa06   : > { %1741 = vrot.lane.b32.xlu1 %v1696_v31, %s2539_s3  ;;  %v1566_v44 = vsel %vm1565_vm2, %v1562_v39, %v1564_v40  ;;  %v1530_v4 = vadd.f32 %v1529_v26, %v1528_v58 }
 0xa07   : > { %1739 = vrot.lane.b32.xlu0 %v1697_v32, %s2539_s3  ;;  %v1568_v48 = vsub.f32 %v2974_v54, %v1566_v44  ;;  %v1549_v57 = vsel %vm1527_vm4, %v1548_v50, 0.0  ;;  %v1611_v44 = vrot.slane %v1610_v36, 2 }
 0xa08   : > { %v1550_v22 = vrot.slane %v1549_v57, 4  ;;  %v1531_v21 = vrot.slane %v1530_v4, 2 }
 0xa09   : > { %v1585_v46 = vpop.permute.xlu1 %1584  ;;  %v1569_v53 = vmul.f32 %v1568_v48, %v1568_v48  ;;  %v1612_v52 = vadd.f32 %v1611_v44, %v1610_v36 }
 0xa0a   : > { %1760 = vrot.lane.b32.xlu1 %v1697_v32, %s2541_s30  ;;  %v1587_v49 = vsel %vm1586_vm3, %v1583_v43, %v1585_v46  ;;  %v1551_v3 = vadd.f32 %v1550_v22, %v1549_v57  ;;  %v1532_v33 = vadd.f32 %v1531_v21, %v1530_v4 }
 0xa0b   : > { %1751 = vrot.lane.b32.xlu0 %v1697_v32, %s2527_s0  ;;  %v1589_v55 = vsub.f32 %v2974_v54, %v1587_v49  ;;  %v1570_v16 = vsel %vm1527_vm4, %v1569_v53, 0.0  ;;  %v1645_v53 = vrot.slane %v1644_v45, 2 }
 0xa0c   : > { %v1571_v62 = vrot.slane %v1570_v16, 4  ;;  %v1552_v11 = vrot.slane %v1551_v3, 2  ;;  %v1533_v43 = vrot.slane %v1532_v33, 1 }
 0xa0d   : > { %v1621_v56 = vpop.permute.xlu1 %1620  ;;  %v1590_v17 = vmul.f32 %v1589_v55, %v1589_v55  ;;  %v1646_v18 = vadd.f32 %v1645_v53, %v1644_v45 }
 0xa0e   : > { %1778 = vrot.lane.b32.xlu1 %v1697_v32, %s2542_s23  ;;  %v1623_v25 = vsub.f32 %v2974_v54, %v1621_v56  ;;  %v1572_v5 = vadd.f32 %v1571_v62, %v1570_v16  ;;  %v1534_v51 = vadd.f32 %v1533_v43, %v1532_v33 }
 0xa0f   : > { %1769 = vrot.lane.b32.xlu0 %v1697_v32, %s2540_s27  ;;  %v1591_v2 = vsel %vm1527_vm4, %v1590_v17, 0.0  ;;  %v1553_v32 = vadd.f32 %v1552_v11, %v1551_v3  ;;  %v1613_v17 = vrot.slane %v1612_v52, 1 }
 0xa10   : > { %v1624_v34 = vmul.f32 %v1623_v25, %v1623_v25  ;;  %v1592_v6 = vrot.slane %v1591_v2, 4  ;;  %v1573_v28 = vrot.slane %v1572_v5, 2  ;;  %v1535_v16 = vsub.f32 0.0, %v1534_v51 }
 0xa11   : > { %v1655_v61 = vpop.permute.xlu1 %1654  ;;  %v1554_v42 = vrot.slane %v1553_v32, 1  ;;  %v1614_v1 = vadd.f32 %v1613_v17, %v1612_v52 }
 0xa12   : > { %v1657_v35 = vsub.f32 %v2974_v54, %v1655_v61  ;;  %v1625_v13 = vsel %vm1527_vm4, %v1624_v34, 0.0  ;;  %v1593_v29 = vadd.f32 %v1592_v6, %v1591_v2  ;;  %v1574_v38 = vadd.f32 %v1573_v28, %v1572_v5 }
 0xa13   : > { %v1626_v31 = vrot.slane %v1625_v13, 4  ;;  %v1555_v50 = vadd.f32 %v1554_v42, %v1553_v32  ;;  %v1536_v63 = vmul.f32 0.8888889, %v1535_v16  ;;  %v1647_v2 = vrot.slane %v1646_v18, 1 }
 0xa14   : > { %v1658_v20 = vmul.f32 %v1657_v35, %v1657_v35  ;;  %v1594_v39 = vrot.slane %v1593_v29, 2  ;;  %v1575_v46 = vrot.slane %v1574_v38, 1  ;;  %v1615_v7 = vsub.f32 0.0, %v1614_v1 }
 0xa15   : > { %v1627_v40 = vadd.f32 %v1626_v31, %v1625_v13  ;;  %v1556_v59 = vsub.f32 0.0, %v1555_v50  ;;  %v1537_v6 = vmul.f32 1.442695, %v1536_v63  ;;  %v1648_v10 = vadd.f32 %v1647_v2, %v1646_v18 }
 0xa16   : > { %v1659_v54 = vsel %vm1527_vm4, %v1658_v20, 0.0  ;;  %v1595_v47 = vadd.f32 %v1594_v39, %v1593_v29  ;;  %v1576_v55 = vadd.f32 %v1575_v46, %v1574_v38  ;;  %v1616_v27 = vmul.f32 0.8888889, %v1615_v7 }
 0xa17   : > { %v1660_v41 = vrot.slane %v1659_v54, 4  ;;  %v1628_v48 = vrot.slane %v1627_v40, 2  ;;  %v1557_v62 = vmul.f32 0.8888889, %v1556_v59  ;;  %v1649_v28 = vsub.f32 0.0, %v1648_v10 }
 0xa18   : > { %v1596_v56 = vrot.slane %v1595_v47, 1  ;;  %v1577_v22 = vsub.f32 0.0, %v1576_v55  ;;  %v1617_v32 = vmul.f32 1.442695, %v1616_v27 }
 0xa19   : > { %v1661_v49 = vadd.f32 %v1660_v41, %v1659_v54  ;;  %v1629_v57 = vadd.f32 %v1628_v48, %v1627_v40  ;;  %v1558_v5 = vmul.f32 1.442695, %v1557_v62  ;;  %v1650_v54 = vmul.f32 0.8888889, %v1649_v28  ;;  %v1508_v41 = vld [vmem:[%s3193_s20] sm:$0xff] }
 0xa1a   : > { %v1597_v25 = vadd.f32 %v1596_v56, %v1595_v47  ;;  %v1578_v3 = vmul.f32 0.8888889, %v1577_v22 }
 0xa1b   : > { %v1662_v58 = vrot.slane %v1661_v49, 2  ;;  %v1630_v26 = vrot.slane %v1629_v57, 1  ;;  %2489 = vpow2.f32 %v1558_v5  ;;  %v1651_v37 = vmul.f32 1.442695, %v1650_v54 }
 0xa1c   : > { %v1598_v34 = vsub.f32 0.0, %v1597_v25  ;;  %v1579_v11 = vmul.f32 1.442695, %v1578_v3  ;;  %2491 = vpow2.f32 %v1537_v6 }
 0xa1d   : > { %v1663_v61 = vadd.f32 %v1662_v58, %v1661_v49  ;;  %v1631_v35 = vadd.f32 %v1630_v26, %v1629_v57 }
 0xa1e   : > { %v1599_v13 = vmul.f32 0.8888889, %v1598_v34  ;;  %2493 = vpow2.f32 %v1579_v11 }
 0xa1f   : > { %v1664_v4 = vrot.slane %v1663_v61, 1  ;;  %v1632_v20 = vsub.f32 0.0, %v1631_v35 }
 0xa20   : > { %v1600_v29 = vmul.f32 1.442695, %v1599_v13 }
 0xa21   : > { %v1665_v21 = vadd.f32 %v1664_v4, %v1663_v61  ;;  %v1633_v30 = vmul.f32 0.8888889, %v1632_v20 }
 0xa22   : > { %2495 = vpow2.f32 %v1600_v29 }
 0xa23   : > { %v1666_v31 = vsub.f32 0.0, %v1665_v21  ;;  %v1634_v33 = vmul.f32 1.442695, %v1633_v30  ;;  %2497 = vpow2.f32 %v1617_v32 }
 0xa25   : > { %v1667_v36 = vmul.f32 0.8888889, %v1666_v31  ;;  %2499 = vpow2.f32 %v1634_v33 }
 0xa26   : > { %2501 = vpow2.f32 %v1651_v37  ;;  %v3084_v37 = vld [vmem:[%s3190_s17] sm:$0xf] }
 0xa27   : > { %v1668_v38 = vmul.f32 1.442695, %v1667_v36 }
 0xa28   : > { %v2490_v39 = vpop.eup %2489 }
 0xa29   : > { %v2492_v42 = vpop.eup %2491  ;;  %2503 = vpow2.f32 %v1668_v38  ;;  %v1560_v45 = vmul.f32 %v2490_v39, %v1508_v41 }
 0xa2a   : > { %v1539_v47 = vmul.f32 %v2492_v42, %v1508_v41 }
 0xa2b   : > { %v2494_v44 = vpop.eup %2493  ;;  %v3042_v52 = vrot.slane %v1560_v45, %v2686_v12 }
 0xa2c   : > { %v1581_v49 = vmul.f32 %v2494_v44, %v1508_v41  ;;  %v3046_v57 = vrot.slane %v1539_v47, %v2694_v19  ;;  %v1749_v19 = vsub.s32 4, %v2683_v8 }
 0xa2e   : > { %v3051_v16 = vrot.slane %v1581_v49, %v998_v15 }
 0xa2f   : > { %v2496_v50 = vpop.eup %2495 }
 0xa30   : > { %v2498_v56 = vpop.eup %2497  ;;  %v1602_v17 = vmul.f32 %v2496_v50, %v1508_v41 }
 0xa31   : > { %v1619_v61 = vmul.f32 %v2498_v56, %v1508_v41 }
 0xa32   : > { %v2500_v22 = vpop.eup %2499  ;;  %v3059_v2 = vrot.slane %v1602_v17, %v1005_v24 }
 0xa33   : > { %v2502_v62 = vpop.eup %2501  ;;  %v1636_v3 = vmul.f32 %v2500_v22, %v1508_v41  ;;  %v3063_v6 = vrot.slane %v1619_v61, %v1749_v19 }
 0xa34   : > { %v1653_v7 = vmul.f32 %v2502_v62, %v1508_v41 }
 0xa35   : > { %v3067_v13 = vrot.slane %v1636_v3, %v1012_v9 }
 0xa36   : > { %v2504_v34 = vpop.eup %2503  ;;  %v3073_v28 = vrot.slane %v1653_v7, %v1019_v14 }
 0xa37   : > { %v1670_v20 = vmul.f32 %v2504_v34, %v1508_v41 }
 0xa39   : > { %v3077_v31 = vrot.slane %v1670_v20, %v1026_v23 }
 0xa6c   : > { %v1707_v40 = vpop.permute.xlu1 %1706 }
 0xa6d   : > { %v1705_v43 = vpop.permute.xlu0 %1704 }
 0xa6e   : > { %v1708_v53 = vsel %vm1522_vm15, %v1705_v43, %v1707_v40 }
 0xa6f   : > { %v1710_v12 = vmul.f32 %v1708_v53, %v3046_v57 }
 0xa70   : > { %v1718_v46 = vpop.permute.xlu1 %1717 }
 0xa71   : > { %v1716_v48 = vpop.permute.xlu0 %1715 }
 0xa72   : > { %v1719_v51 = vsel %vm1544_vm14, %v1716_v48, %v1718_v46 }
 0xa73   : > { %v1721_v58 = vmul.f32 %v1719_v51, %v3042_v52 }
 0xa74   : > { %v1730_v55 = vpop.permute.xlu1 %1729 }
 0xa75   : > { %v1728_v59 = vpop.permute.xlu0 %1727  ;;  %v1722_v63 = vadd.f32 %v1721_v58, %v1710_v12 }
 0xa76   : > { %v1731_v18 = vsel %vm1565_vm2, %v1728_v59, %v1730_v55 }
 0xa77   : > { %v1733_v25 = vmul.f32 %v1731_v18, %v3051_v16 }
 0xa78   : > { %v1742_v26 = vpop.permute.xlu1 %1741 }
 0xa79   : > { %v1740_v1 = vpop.permute.xlu0 %1739  ;;  %v1734_v35 = vadd.f32 %v1733_v25, %v1722_v63 }
 0xa7a   : > { %v1743_v15 = vsel %vm1586_vm3, %v1740_v1, %v1742_v26 }
 0xa7b   : > { %v1745_v4 = vmul.f32 %v1743_v15, %v3059_v2 }
 0xa7c   : > { %v1761_v5 = vpop.permute.xlu1 %1760 }
 0xa7d   : > { %v1752_v10 = vpop.permute.xlu0 %1751  ;;  %v1746_v11 = vadd.f32 %v1745_v4, %v1734_v35  ;;  %v1763_v21 = vmul.f32 %v1761_v5, %v3067_v13 }
 0xa7e   : > { %v1754_v24 = vmul.f32 %v1752_v10, %v3063_v6 }
 0xa80   : > { %v1755_v27 = vadd.f32 %v1754_v24, %v1746_v11  ;;  %v1779_v29 = vpop.permute.xlu1 %1778 }
 0xa81   : > { %v1770_v30 = vpop.permute.xlu0 %1769  ;;  %v1781_v54 = vmul.f32 %v1779_v29, %v3077_v31 }
 0xa82   : > { %v1764_v32 = vadd.f32 %v1763_v21, %v1755_v27  ;;  %v1772_v9 = vmul.f32 %v1770_v30, %v3073_v28 }
 0xa84   : > { %v1773_v33 = vadd.f32 %v1772_v9, %v1764_v32 }
 0xa86   : > { %v1782_v36 = vadd.f32 %v1781_v54, %v1773_v33 }
 0xa88   : > { %2425 = vmatpush3.msk.msra.mxu1 %vm683_vm1, %v1782_v36 }
 0xa89   : > { %2427 = vmatmul.mubr.msk.f32.vlgmr.msra.gmra.mxu1 %vm1783_vm5, %v3084_v37  ;;  %2429 = vmatprep.subr.mxu1 %v2521_v0 }
 0xa8a   : > { %2431 = vmatprep.mubr.msk.f32.mxu1 %vm2522_vm0, %v2521_v0 }
 0xb49   : > { %v1856_v8 = vpop.f32.mrf.mxu1 }
 0xb4a   : > { %v1860_v14 = vsub.f32 %v2981_v60, %v1856_v8 }
 0xb4b   : > { %v2428_v23 = vpop.f32.mrf.mxu1 }
 0xb4c   : > { %v1861_v38 = vsel %vm1672_vm13, %v1860_v14, -inf }
 0xb4d   : > { %v1862_v39 = vrot.slane %v1861_v38, 4 }
 0xb4f   : > { %v1863_v40 = vmax.f32 %v1861_v38, %v1862_v39 }
 0xb51   : > { %v1864_v41 = vrot.slane %v1863_v40, 2 }
 0xb53   : > { %v1865_v42 = vmax.f32 %v1863_v40, %v1864_v41 }
 0xb55   : > { %v1866_v43 = vrot.slane %v1865_v42, 1 }
 0xb57   : > { %v1867_v44 = vmax.f32 %v1865_v42, %v1866_v43 }
 0xb59   : > { %v1868_v45 = vsub.f32 %v1860_v14, %v1867_v44 }
 0xb5b   : > { %v1869_v46 = vmul.f32 1.442695, %v1868_v45 }
 0xb5d   : > { %2505 = vpow2.f32 %v1869_v46 }
 0xb6a   : > { %v2506_v47 = vpop.eup %2505 }
 0xb6b   : > { %v1871_v48 = vsel %vm1672_vm13, %v2506_v47, 0.0 }
 0xb6c   : > { %v1872_v49 = vrot.slane %v1871_v48, 4 }
 0xb6e   : > { %v1873_v50 = vadd.f32 %v1872_v49, %v1871_v48 }
 0xb70   : > { %v1874_v51 = vrot.slane %v1873_v50, 2 }
 0xb72   : > { %v1875_v53 = vadd.f32 %v1874_v51, %v1873_v50 }
 0xb74   : > { %v1876_v55 = vrot.slane %v1875_v53, 1 }
 0xb76   : > { %v1877_v56 = vadd.f32 %v1876_v55, %v1875_v53 }
 0xb78   : > { %2507 = vrcp.f32 %v1877_v56 }
 0xb85   : > { %v2508_v58 = vpop.eup %2507 }
 0xb86   : > { %v1879_v59 = vmul.f32 %v2508_v58, %v2506_v47 }
 0xb88   : > { %1880 = vrot.lane.b32.xlu0 %v1879_v59, %s2535_s24 }
 0xbfa   : > { %v1881_v17 = vpop.permute.xlu0 %1880 }
 0xbfb   : > { %v1882_v18 = vsel %vm1509_vm12, %v1881_v17, %v1879_v59 }
 0xbfc   : > { %1883 = vrot.lane.b32.xlu1 %v1882_v18, %s2535_s24 }
 0xc6e   : > { %v1884_v22 = vpop.permute.xlu1 %1883 }
 0xc6f   : > { %v1885_v12 = vsel %vm1509_vm12, %v1884_v22, %v1879_v59  ;;  %1890 = vrot.lane.b32.xlu1 %v1884_v22, %s2536_s28 }
 0xc70   : > { %1888 = vrot.lane.b32.xlu0 %v1885_v12, %s2536_s28 }
 0xc73   : > { %1897 = vrot.lane.b32.xlu1 %v1884_v22, %s2537_s5 }
 0xc74   : > { %1895 = vrot.lane.b32.xlu0 %v1885_v12, %s2537_s5 }
 0xc77   : > { %1905 = vrot.lane.b32.xlu1 %v1884_v22, %s2538_s26 }
 0xc78   : > { %1903 = vrot.lane.b32.xlu0 %v1885_v12, %s2538_s26 }
 0xc7b   : > { %1913 = vrot.lane.b32.xlu1 %v1884_v22, %s2539_s3 }
 0xc7c   : > { %1911 = vrot.lane.b32.xlu0 %v1885_v12, %s2539_s3 }
 0xc7f   : > { %1924 = vrot.lane.b32.xlu1 %v1885_v12, %s2541_s30 }
 0xc80   : > { %1919 = vrot.lane.b32.xlu0 %v1885_v12, %s2527_s0 }
 0xc83   : > { %1934 = vrot.lane.b32.xlu1 %v1885_v12, %s2542_s23 }
 0xc84   : > { %1929 = vrot.lane.b32.xlu0 %v1885_v12, %s2540_s27 }
 0xce1   : > { %v1891_v25 = vpop.permute.xlu1 %1890 }
 0xce2   : > { %v1889_v26 = vpop.permute.xlu0 %1888 }
 0xce3   : > { %v1892_v63 = vsel %vm1522_vm15, %v1889_v26, %v1891_v25 }
 0xce4   : > { %v1894_v35 = vmul.f32 %v1892_v63, %v3046_v57 }
 0xce5   : > { %v1898_v61 = vpop.permute.xlu1 %1897 }
 0xce6   : > { %v1896_v19 = vpop.permute.xlu0 %1895 }
 0xce7   : > { %v1899_v62 = vsel %vm1544_vm14, %v1896_v19, %v1898_v61 }
 0xce8   : > { %v1901_v15 = vmul.f32 %v1899_v62, %v3042_v52 }
 0xce9   : > { %v1906_v1 = vpop.permute.xlu1 %1905 }
 0xcea   : > { %v1904_v3 = vpop.permute.xlu0 %1903  ;;  %v1902_v7 = vadd.f32 %v1901_v15, %v1894_v35 }
 0xceb   : > { %v1907_v34 = vsel %vm1565_vm2, %v1904_v3, %v1906_v1 }
 0xcec   : > { %v1909_v4 = vmul.f32 %v1907_v34, %v3051_v16 }
 0xced   : > { %v1914_v5 = vpop.permute.xlu1 %1913 }
 0xcee   : > { %v1912_v10 = vpop.permute.xlu0 %1911  ;;  %v1910_v24 = vadd.f32 %v1909_v4, %v1902_v7 }
 0xcef   : > { %v1915_v11 = vsel %vm1586_vm3, %v1912_v10, %v1914_v5 }
 0xcf0   : > { %v1917_v20 = vmul.f32 %v1915_v11, %v3059_v2 }
 0xcf1   : > { %v1925_v21 = vpop.permute.xlu1 %1924 }
 0xcf2   : > { %v1920_v27 = vpop.permute.xlu0 %1919  ;;  %v1918_v29 = vadd.f32 %v1917_v20, %v1910_v24  ;;  %v1927_v32 = vmul.f32 %v1925_v21, %v3067_v13 }
 0xcf3   : > { %v1922_v30 = vmul.f32 %v1920_v27, %v3063_v6 }
 0xcf5   : > { %v1923_v9 = vadd.f32 %v1922_v30, %v1918_v29  ;;  %v1935_v54 = vpop.permute.xlu1 %1934 }
 0xcf6   : > { %v1930_v33 = vpop.permute.xlu0 %1929  ;;  %v1937_v14 = vmul.f32 %v1935_v54, %v3077_v31 }
 0xcf7   : > { %v1928_v36 = vadd.f32 %v1927_v32, %v1923_v9  ;;  %v1932_v8 = vmul.f32 %v1930_v33, %v3073_v28 }
 0xcf9   : > { %v1933_v23 = vadd.f32 %v1932_v8, %v1928_v36 }
 0xcfb   : > { %v1938_v38 = vadd.f32 %v1937_v14, %v1933_v23 }
 0xcfd   : > { %2430 = vmatpush3.msk.msra.mxu1 %vm683_vm1, %v1938_v38 }
 0xcfe   : > { %2432 = vmatmul.mubr.msk.f32.vlgmr.msra.gmra.mxu1 %vm1783_vm5, %v3084_v37  ;;  %2434 = vmatprep.subr.mxu1 %v2521_v0 }
 0xcff   : > { %2436 = vmatprep.mubr.msk.f32.mxu1 %vm2522_vm0, %v2521_v0 }
 0xdbe   : > { %v2008_v39 = vpop.f32.mrf.mxu1 }
 0xdbf   : > { %v2012_v40 = vsub.f32 %v2981_v60, %v2008_v39 }
 0xdc0   : > { %v2433_v41 = vpop.f32.mrf.mxu1 }
 0xdc1   : > { %v2013_v42 = vsel %vm1672_vm13, %v2012_v40, -inf }
 0xdc2   : > { %v2014_v43 = vrot.slane %v2013_v42, 4 }
 0xdc4   : > { %v2015_v44 = vmax.f32 %v2013_v42, %v2014_v43 }
 0xdc6   : > { %v2016_v45 = vrot.slane %v2015_v44, 2 }
 0xdc8   : > { %v2017_v46 = vmax.f32 %v2015_v44, %v2016_v45 }
 0xdca   : > { %v2018_v47 = vrot.slane %v2017_v46, 1 }
 0xdcc   : > { %v2019_v48 = vmax.f32 %v2017_v46, %v2018_v47 }
 0xdce   : > { %v2020_v49 = vsub.f32 %v2012_v40, %v2019_v48 }
 0xdd0   : > { %v2021_v50 = vmul.f32 1.442695, %v2020_v49 }
 0xdd2   : > { %2509 = vpow2.f32 %v2021_v50 }
 0xddf   : > { %v2510_v51 = vpop.eup %2509 }
 0xde0   : > { %v2023_v53 = vsel %vm1672_vm13, %v2510_v51, 0.0 }
 0xde1   : > { %v2024_v55 = vrot.slane %v2023_v53, 4 }
 0xde3   : > { %v2025_v0 = vadd.f32 %v2024_v55, %v2023_v53 }
 0xde5   : > { %v2026_v56 = vrot.slane %v2025_v0, 2 }
 0xde7   : > { %v2027_v58 = vadd.f32 %v2026_v56, %v2025_v0 }
 0xde9   : > { %v2028_v59 = vrot.slane %v2027_v58, 1 }
 0xdeb   : > { %v2029_v17 = vadd.f32 %v2028_v59, %v2027_v58 }
 0xded   : > { %2511 = vrcp.f32 %v2029_v17 }
 0xdfa   : > { %v2512_v18 = vpop.eup %2511 }
 0xdfb   : > { %v2031_v22 = vmul.f32 %v2512_v18, %v2510_v51 }
 0xdfd   : > { %2032 = vrot.lane.b32.xlu0 %v2031_v22, %s2535_s24 }
 0xe6f   : > { %v2033_v12 = vpop.permute.xlu0 %2032 }
 0xe70   : > { %v2034_v25 = vsel %vm1509_vm12, %v2033_v12, %v2031_v22 }
 0xe71   : > { %2035 = vrot.lane.b32.xlu1 %v2034_v25, %s2535_s24 }
 0xee3   : > { %v2036_v26 = vpop.permute.xlu1 %2035 }
 0xee4   : > { %v2037_v61 = vsel %vm1509_vm12, %v2036_v26, %v2031_v22  ;;  %2042 = vrot.lane.b32.xlu1 %v2036_v26, %s2536_s28 }
 0xee5   : > { %2040 = vrot.lane.b32.xlu0 %v2037_v61, %s2536_s28  ;;  %s668_s28 = scalar_lea.vmem %s3194_s21, %s2237_s22 }
 0xee8   : > { %2049 = vrot.lane.b32.xlu1 %v2036_v26, %s2537_s5 }
 0xee9   : > { %2047 = vrot.lane.b32.xlu0 %v2037_v61, %s2537_s5 }
 0xeec   : > { %2057 = vrot.lane.b32.xlu1 %v2036_v26, %s2538_s26 }
 0xeed   : > { %2055 = vrot.lane.b32.xlu0 %v2037_v61, %s2538_s26 }
 0xef0   : > { %2065 = vrot.lane.b32.xlu1 %v2036_v26, %s2539_s3 }
 0xef1   : > { %2063 = vrot.lane.b32.xlu0 %v2037_v61, %s2539_s3 }
 0xef4   : > { %2076 = vrot.lane.b32.xlu1 %v2037_v61, %s2541_s30 }
 0xef5   : > { %2071 = vrot.lane.b32.xlu0 %v2037_v61, %s2527_s0 }
 0xef8   : > { %2086 = vrot.lane.b32.xlu1 %v2037_v61, %s2542_s23 }
 0xef9   : > { %2081 = vrot.lane.b32.xlu0 %v2037_v61, %s2540_s27 }
 0xf56   : > { %v2043_v19 = vpop.permute.xlu1 %2042 }
 0xf57   : > { %v2041_v62 = vpop.permute.xlu0 %2040 }
 0xf58   : > { %v2044_v3 = vsel %vm1522_vm15, %v2041_v62, %v2043_v19 }
 0xf59   : > { %v2046_v7 = vmul.f32 %v2044_v3, %v3046_v57 }
 0xf5a   : > { %v2050_v63 = vpop.permute.xlu1 %2049 }
 0xf5b   : > { %v2048_v1 = vpop.permute.xlu0 %2047 }
 0xf5c   : > { %v2051_v15 = vsel %vm1544_vm14, %v2048_v1, %v2050_v63 }
 0xf5d   : > { %v2053_v35 = vmul.f32 %v2051_v15, %v3042_v52 }
 0xf5e   : > { %v2058_v34 = vpop.permute.xlu1 %2057 }
 0xf5f   : > { %v2056_v4 = vpop.permute.xlu0 %2055  ;;  %v2054_v24 = vadd.f32 %v2053_v35, %v2046_v7 }
 0xf60   : > { %v2059_v5 = vsel %vm1565_vm2, %v2056_v4, %v2058_v34 }
 0xf61   : > { %v2061_v10 = vmul.f32 %v2059_v5, %v3051_v16 }
 0xf62   : > { %v2066_v11 = vpop.permute.xlu1 %2065 }
 0xf63   : > { %v2064_v20 = vpop.permute.xlu0 %2063  ;;  %v2062_v27 = vadd.f32 %v2061_v10, %v2054_v24 }
 0xf64   : > { %v2067_v21 = vsel %vm1586_vm3, %v2064_v20, %v2066_v11 }
 0xf65   : > { %v2069_v29 = vmul.f32 %v2067_v21, %v3059_v2 }
 0xf66   : > { %v2077_v30 = vpop.permute.xlu1 %2076 }
 0xf67   : > { %v2072_v32 = vpop.permute.xlu0 %2071  ;;  %v2070_v9 = vadd.f32 %v2069_v29, %v2062_v27  ;;  %v2079_v54 = vmul.f32 %v2077_v30, %v3067_v13 }
 0xf68   : > { %v2074_v52 = vmul.f32 %v2072_v32, %v3063_v6 }
 0xf6a   : > { %v2075_v33 = vadd.f32 %v2074_v52, %v2070_v9  ;;  %v2087_v57 = vpop.permute.xlu1 %2086 }
 0xf6b   : > { %v2082_v36 = vpop.permute.xlu0 %2081  ;;  %v2089_v14 = vmul.f32 %v2087_v57, %v3077_v31 }
 0xf6c   : > { %v2080_v16 = vadd.f32 %v2079_v54, %v2075_v33  ;;  %v2084_v8 = vmul.f32 %v2082_v36, %v3073_v28 }
 0xf6e   : > { %v2085_v23 = vadd.f32 %v2084_v8, %v2080_v16 }
 0xf70   : > { %v2090_v38 = vadd.f32 %v2089_v14, %v2085_v23 }
 0xf72   : > { %2435 = vmatpush3.msk.msra.mxu1 %vm683_vm1, %v2090_v38 }
 0xf73   : > { %2437 = vmatmul.mubr.msk.f32.vlgmr.msra.gmra.mxu1 %vm1783_vm5, %v3084_v37 }
0x1033   : > { %v2160_v2 = vpop.f32.mrf.mxu1 }
0x1034   : > { %v2164_v6 = vsub.f32 %v2981_v60, %v2160_v2 }
0x1035   : > { %v2438_v13 = vpop.f32.mrf.mxu1 }
0x1036   : > { %2165 = vst.msk [vmem:[%s668_s28] sm:$0xf] %vm1672_vm13, %v2164_v6 }
0x1037 PF: > { %s31_s2 = sadd.s32 1, %s2519_s2  }
0x1038   : > { %p28_p4 = scmp.ge.s32.totalorder %s31_s2, 4  }
0x103a   :  { %30 = sbr.rel (!%p28_p4) target bundleno = 7 (0x7), region = 137 }

</bundles_post_ra>
